<compile_context>
chip_gen: v7x
topology: tpu7x:2x2x1
jax: 0.10.0
libtpu: 0.0.40
codegen_flags: <defaults>
</compile_context>

<pallas_src>
import jax
import jax.numpy as jnp
from jax.experimental import pallas as pl
from jax.experimental.pallas import tpu as pltpu

# MLP layer sizes of self.net
LAYER_SIZES = [28 * 28 * 1, 512, 256, 128, 64, 32, 1]
IN_FEATURES = LAYER_SIZES[0]          # 784


def _round_up(x, m):
    return ((x + m - 1) // m) * m


def _pick_tile_b(B):
    """Batch tile size.

    * B < 256: one full-array tile (block == full array is always legal,
      even for ragged B), minimal per-step overhead.
    * B >= 256: lane/sublane aligned tiles (multiple of 128, capped at 1024)
      chosen so the grid has >= 2 steps -> both v7x TensorCores get work.
    """
    if B < 256:
        return B
    return min(1024, _round_up(pl.cdiv(B, 2), 128))


def _mlp_kernel(x_ref,
                w1_ref, b1_ref,
                w2_ref, b2_ref,
                w3_ref, b3_ref,
                w4_ref, b4_ref,
                w5_ref, b5_ref,
                w6_ref, b6_ref,
                out_ref):
    """One batch tile of the MLP. Weights are bf16 and VMEM-resident."""
    # Input tile arrives as f32; cast to bf16 in-kernel (no wrapper-side copy).
    h = x_ref[...].astype(jnp.bfloat16)              # (TILE_B, 784)

    def dense_relu(h, w_ref, b_ref):
        # bf16 x bf16 -> f32 accumulation on the MXU; bias + ReLU in f32 (VPU).
        acc = jnp.dot(h, w_ref[...], preferred_element_type=jnp.float32)
        return jnp.maximum(acc + b_ref[...], 0.0).astype(jnp.bfloat16)

    h = dense_relu(h, w1_ref, b1_ref)                # 784 -> 512
    h = dense_relu(h, w2_ref, b2_ref)                # 512 -> 256
    h = dense_relu(h, w3_ref, b3_ref)                # 256 -> 128
    h = dense_relu(h, w4_ref, b4_ref)                # 128 -> 64
    h = dense_relu(h, w5_ref, b5_ref)                # 64  -> 32

    # Final 32 -> 1, emitted lane-dense as a (1, TILE_B) row:
    #   (1, 32) f32 contracted with (TILE_B, 32) f32 over the 32-dim.
    logits = jax.lax.dot_general(
        w6_ref[...], h.astype(jnp.float32),
        dimension_numbers=(((1,), (1,)), ((), ())),
        preferred_element_type=jnp.float32) + b6_ref[...]   # (1, TILE_B)
    out_ref[...] = logits.astype(out_ref.dtype)


def prepare_params(params):
    """One-time conversion of (W, b) pairs into kernel-ready arrays.

    Hoisted out of the forward so the casts/transposes don't re-run (and
    re-traffic HBM) on every training step.
    """
    prepared = []
    n_layers = len(params)
    for i, (w, b) in enumerate(params):
        if i == n_layers - 1:
            # Last layer (32 -> 1): kept f32 and transposed to (1, 32) so the
            # kernel can emit a lane-dense (1, TILE_B) logits row directly.
            w_arr = jnp.asarray(w).T.astype(jnp.float32)
        else:
            w_arr = jnp.asarray(w).astype(jnp.bfloat16)
        b_arr = jnp.asarray(b).reshape(1, -1).astype(jnp.float32)
        prepared.append((w_arr, b_arr))
    return prepared


def discriminator_forward(x_nchw, prepared_params):
    """x_nchw: (B, 1, 28, 28) float32. prepared_params: output of prepare_params."""
    B = x_nchw.shape[0]

    # nn.Flatten on NCHW (row-major). No cast / pad here: the kernel casts.
    x_flat = x_nchw.reshape(B, IN_FEATURES)

    flat_args = []
    flat_specs = []
    for (w_arr, b_arr) in prepared_params:
        # Full-array blocks with constant index_map -> weights stay VMEM-resident.
        flat_args.append(w_arr)
        flat_specs.append(pl.BlockSpec(w_arr.shape, lambda i: (0, 0)))
        flat_args.append(b_arr)
        flat_specs.append(pl.BlockSpec(b_arr.shape, lambda i: (0, 0)))

    tile_b = _pick_tile_b(B)
    grid = (pl.cdiv(B, tile_b),)

    in_specs = [pl.BlockSpec((tile_b, IN_FEATURES), lambda i: (i, 0))] + flat_specs
    # Lane-dense output: (1, B) array, (1, tile_b) blocks.
    out_spec = pl.BlockSpec((1, tile_b), lambda i: (0, i))

    out_row = pl.pallas_call(
        _mlp_kernel,
        out_shape=jax.ShapeDtypeStruct((1, B), jnp.float32),
        grid=grid,
        in_specs=in_specs,
        out_specs=out_spec,
        compiler_params=pltpu.CompilerParams(
            dimension_semantics=("parallel",),
            vmem_limit_bytes=32 << 20,
        ),
    )(x_flat, *flat_args)
    return out_row.reshape(B, 1)


def init_params(key):
    """Deterministic synthetic init matching nn.Linear shapes of self.net."""
    params = []
    for i in range(len(LAYER_SIZES) - 1):
        fan_in, fan_out = LAYER_SIZES[i], LAYER_SIZES[i + 1]
        key, kw, kb = jax.random.split(key, 3)
        bound = 1.0 / jnp.sqrt(jnp.float32(fan_in))
        # PyTorch stores weight as (out, in); we keep the transpose (in, out).
        w = jax.random.uniform(kw, (fan_in, fan_out), jnp.float32, -bound, bound)
        b = jax.random.uniform(kb, (fan_out,), jnp.float32, -bound, bound)
        params.append((w, b))
    return params


def reference_forward(x_nchw, params):
    """Pure-JAX reference with the same bf16-matmul / f32-accumulation recipe."""
    h = x_nchw.reshape(x_nchw.shape[0], -1)
    n_layers = len(params)
    for i, (w, b) in enumerate(params):
        if i < n_layers - 1:
            acc = jnp.dot(h.astype(jnp.bfloat16), w.astype(jnp.bfloat16),
                          preferred_element_type=jnp.float32) + b
            h = jnp.maximum(acc, 0.0).astype(jnp.bfloat16)
        else:
            h = jnp.dot(h.astype(jnp.float32), w,
                        preferred_element_type=jnp.float32) + b
    return h


if __name__ == "__main__":
    key = jax.random.PRNGKey(0)
    key, kx = jax.random.split(key)

    # Small MNIST-shaped batch: (B, C, H, W) = (8, 1, 28, 28)
    x = jax.random.normal(kx, (8, 1, 28, 28), jnp.float32)
    params = init_params(key)
    prepared = prepare_params(params)   # one-time weight prep (hoisted)

    logits = discriminator_forward(x, prepared)
    jax.block_until_ready(logits)

    ref = reference_forward(x, params)
    assert logits.shape == (8, 1), logits.shape
    assert jnp.allclose(logits, ref, atol=1e-2, rtol=1e-2), "mismatch vs reference"

    print("KERNEL_OK")
</pallas_src>

<mosaic_0001>
module attributes {stable_mosaic.version = 11 : i64} {
  func.func @_mlp_kernel(%arg0: i32, %arg1: memref<8x784xf32, #tpu.memory_space<vmem>>, %arg2: memref<784x512xbf16, #tpu.memory_space<vmem>>, %arg3: memref<1x512xf32, #tpu.memory_space<vmem>>, %arg4: memref<512x256xbf16, #tpu.memory_space<vmem>>, %arg5: memref<1x256xf32, #tpu.memory_space<vmem>>, %arg6: memref<256x128xbf16, #tpu.memory_space<vmem>>, %arg7: memref<1x128xf32, #tpu.memory_space<vmem>>, %arg8: memref<128x64xbf16, #tpu.memory_space<vmem>>, %arg9: memref<1x64xf32, #tpu.memory_space<vmem>>, %arg10: memref<64x32xbf16, #tpu.memory_space<vmem>>, %arg11: memref<1x32xf32, #tpu.memory_space<vmem>>, %arg12: memref<1x32xf32, #tpu.memory_space<vmem>>, %arg13: memref<1x1xf32, #tpu.memory_space<vmem>>, %arg14: memref<1x8xf32, #tpu.memory_space<vmem>>) attributes {dimension_semantics = [#tpu.dimension_semantics<parallel>], iteration_bounds = array<i64: 1>, scalar_prefetch = 0 : i64, scratch_operands = 0 : i64, tpu.core_type = #tpu.core_type<tc>, window_params = [{transform_indices = @transform_0, window_bounds = array<i64: 8, 784>}, {pipeline_mode = #tpu.pipeline_mode<synchronous>, transform_indices = @transform_1, window_bounds = array<i64: 784, 512>}, {pipeline_mode = #tpu.pipeline_mode<synchronous>, transform_indices = @transform_2, window_bounds = array<i64: 1, 512>}, {pipeline_mode = #tpu.pipeline_mode<synchronous>, transform_indices = @transform_3, window_bounds = array<i64: 512, 256>}, {pipeline_mode = #tpu.pipeline_mode<synchronous>, transform_indices = @transform_4, window_bounds = array<i64: 1, 256>}, {pipeline_mode = #tpu.pipeline_mode<synchronous>, transform_indices = @transform_5, window_bounds = array<i64: 256, 128>}, {pipeline_mode = #tpu.pipeline_mode<synchronous>, transform_indices = @transform_6, window_bounds = array<i64: 1, 128>}, {pipeline_mode = #tpu.pipeline_mode<synchronous>, transform_indices = @transform_7, window_bounds = array<i64: 128, 64>}, {pipeline_mode = #tpu.pipeline_mode<synchronous>, transform_indices = @transform_8, window_bounds = array<i64: 1, 64>}, {pipeline_mode = #tpu.pipeline_mode<synchronous>, transform_indices = @transform_9, window_bounds = array<i64: 64, 32>}, {pipeline_mode = #tpu.pipeline_mode<synchronous>, transform_indices = @transform_10, window_bounds = array<i64: 1, 32>}, {pipeline_mode = #tpu.pipeline_mode<synchronous>, transform_indices = @transform_11, window_bounds = array<i64: 1, 32>}, {pipeline_mode = #tpu.pipeline_mode<synchronous>, transform_indices = @transform_12, window_bounds = array<i64: 1, 1>}, {transform_indices = @transform_13, window_bounds = array<i64: 1, 8>}]} {
    %c0 = arith.constant 0 : index
    %c0_0 = arith.constant 0 : index
    %0 = vector.load %arg1[%c0, %c0_0] : memref<8x784xf32, #tpu.memory_space<vmem>>, vector<8x784xf32>
    %1 = arith.truncf %0 : vector<8x784xf32> to vector<8x784xbf16>
    %c0_1 = arith.constant 0 : index
    %c0_2 = arith.constant 0 : index
    %2 = vector.load %arg2[%c0_1, %c0_2] : memref<784x512xbf16, #tpu.memory_space<vmem>>, vector<784x512xbf16>
    %cst = arith.constant dense<0.000000e+00> : vector<8x512xf32>
    %3 = tpu.matmul %1, %2, %cst {dimension_numbers = #tpu.dot_dimension_numbers<[1], [0], [0], [1], [0, 0, 1, 1], [], []>} : vector<8x784xbf16>, vector<784x512xbf16>, vector<8x512xf32> -> vector<8x512xf32>
    %c0_3 = arith.constant 0 : index
    %c0_4 = arith.constant 0 : index
    %4 = vector.load %arg3[%c0_3, %c0_4] : memref<1x512xf32, #tpu.memory_space<vmem>>, vector<1x512xf32>
    %5 = vector.broadcast %4 : vector<1x512xf32> to vector<8x512xf32>
    %6 = arith.addf %3, %5 : vector<8x512xf32>
    %cst_5 = arith.constant 0.000000e+00 : f32
    %7 = vector.broadcast %cst_5 : f32 to vector<8x512xf32>
    %8 = arith.maximumf %6, %7 : vector<8x512xf32>
    %9 = arith.truncf %8 : vector<8x512xf32> to vector<8x512xbf16>
    %c0_6 = arith.constant 0 : index
    %c0_7 = arith.constant 0 : index
    %10 = vector.load %arg4[%c0_6, %c0_7] : memref<512x256xbf16, #tpu.memory_space<vmem>>, vector<512x256xbf16>
    %cst_8 = arith.constant dense<0.000000e+00> : vector<8x256xf32>
    %11 = tpu.matmul %9, %10, %cst_8 {dimension_numbers = #tpu.dot_dimension_numbers<[1], [0], [0], [1], [0, 0, 1, 1], [], []>} : vector<8x512xbf16>, vector<512x256xbf16>, vector<8x256xf32> -> vector<8x256xf32>
    %c0_9 = arith.constant 0 : index
    %c0_10 = arith.constant 0 : index
    %12 = vector.load %arg5[%c0_9, %c0_10] : memref<1x256xf32, #tpu.memory_space<vmem>>, vector<1x256xf32>
    %13 = vector.broadcast %12 : vector<1x256xf32> to vector<8x256xf32>
    %14 = arith.addf %11, %13 : vector<8x256xf32>
    %cst_11 = arith.constant 0.000000e+00 : f32
    %15 = vector.broadcast %cst_11 : f32 to vector<8x256xf32>
    %16 = arith.maximumf %14, %15 : vector<8x256xf32>
    %17 = arith.truncf %16 : vector<8x256xf32> to vector<8x256xbf16>
    %c0_12 = arith.constant 0 : index
    %c0_13 = arith.constant 0 : index
    %18 = vector.load %arg6[%c0_12, %c0_13] : memref<256x128xbf16, #tpu.memory_space<vmem>>, vector<256x128xbf16>
    %cst_14 = arith.constant dense<0.000000e+00> : vector<8x128xf32>
    %19 = tpu.matmul %17, %18, %cst_14 {dimension_numbers = #tpu.dot_dimension_numbers<[1], [0], [0], [1], [0, 0, 1, 1], [], []>} : vector<8x256xbf16>, vector<256x128xbf16>, vector<8x128xf32> -> vector<8x128xf32>
    %c0_15 = arith.constant 0 : index
    %c0_16 = arith.constant 0 : index
    %20 = vector.load %arg7[%c0_15, %c0_16] : memref<1x128xf32, #tpu.memory_space<vmem>>, vector<1x128xf32>
    %21 = vector.broadcast %20 : vector<1x128xf32> to vector<8x128xf32>
    %22 = arith.addf %19, %21 : vector<8x128xf32>
    %cst_17 = arith.constant 0.000000e+00 : f32
    %23 = vector.broadcast %cst_17 : f32 to vector<8x128xf32>
    %24 = arith.maximumf %22, %23 : vector<8x128xf32>
    %25 = arith.truncf %24 : vector<8x128xf32> to vector<8x128xbf16>
    %c0_18 = arith.constant 0 : index
    %c0_19 = arith.constant 0 : index
    %26 = vector.load %arg8[%c0_18, %c0_19] : memref<128x64xbf16, #tpu.memory_space<vmem>>, vector<128x64xbf16>
    %cst_20 = arith.constant dense<0.000000e+00> : vector<8x64xf32>
    %27 = tpu.matmul %25, %26, %cst_20 {dimension_numbers = #tpu.dot_dimension_numbers<[1], [0], [0], [1], [0, 0, 1, 1], [], []>} : vector<8x128xbf16>, vector<128x64xbf16>, vector<8x64xf32> -> vector<8x64xf32>
    %c0_21 = arith.constant 0 : index
    %c0_22 = arith.constant 0 : index
    %28 = vector.load %arg9[%c0_21, %c0_22] : memref<1x64xf32, #tpu.memory_space<vmem>>, vector<1x64xf32>
    %29 = vector.broadcast %28 : vector<1x64xf32> to vector<8x64xf32>
    %30 = arith.addf %27, %29 : vector<8x64xf32>
    %cst_23 = arith.constant 0.000000e+00 : f32
    %31 = vector.broadcast %cst_23 : f32 to vector<8x64xf32>
    %32 = arith.maximumf %30, %31 : vector<8x64xf32>
    %33 = arith.truncf %32 : vector<8x64xf32> to vector<8x64xbf16>
    %c0_24 = arith.constant 0 : index
    %c0_25 = arith.constant 0 : index
    %34 = vector.load %arg10[%c0_24, %c0_25] : memref<64x32xbf16, #tpu.memory_space<vmem>>, vector<64x32xbf16>
    %cst_26 = arith.constant dense<0.000000e+00> : vector<8x32xf32>
    %35 = tpu.matmul %33, %34, %cst_26 {dimension_numbers = #tpu.dot_dimension_numbers<[1], [0], [0], [1], [0, 0, 1, 1], [], []>} : vector<8x64xbf16>, vector<64x32xbf16>, vector<8x32xf32> -> vector<8x32xf32>
    %c0_27 = arith.constant 0 : index
    %c0_28 = arith.constant 0 : index
    %36 = vector.load %arg11[%c0_27, %c0_28] : memref<1x32xf32, #tpu.memory_space<vmem>>, vector<1x32xf32>
    %37 = vector.broadcast %36 : vector<1x32xf32> to vector<8x32xf32>
    %38 = arith.addf %35, %37 : vector<8x32xf32>
    %cst_29 = arith.constant 0.000000e+00 : f32
    %39 = vector.broadcast %cst_29 : f32 to vector<8x32xf32>
    %40 = arith.maximumf %38, %39 : vector<8x32xf32>
    %41 = arith.truncf %40 : vector<8x32xf32> to vector<8x32xbf16>
    %c0_30 = arith.constant 0 : index
    %c0_31 = arith.constant 0 : index
    %42 = vector.load %arg12[%c0_30, %c0_31] : memref<1x32xf32, #tpu.memory_space<vmem>>, vector<1x32xf32>
    %43 = arith.extf %41 : vector<8x32xbf16> to vector<8x32xf32>
    %cst_32 = arith.constant dense<0.000000e+00> : vector<1x8xf32>
    %44 = tpu.matmul %42, %43, %cst_32 {dimension_numbers = #tpu.dot_dimension_numbers<[1], [1], [0], [0], [0, 0, 1, 0], [], []>} : vector<1x32xf32>, vector<8x32xf32>, vector<1x8xf32> -> vector<1x8xf32>
    %c0_33 = arith.constant 0 : index
    %c0_34 = arith.constant 0 : index
    %45 = vector.load %arg13[%c0_33, %c0_34] : memref<1x1xf32, #tpu.memory_space<vmem>>, vector<1x1xf32>
    %46 = vector.broadcast %45 : vector<1x1xf32> to vector<1x8xf32>
    %47 = arith.addf %44, %46 : vector<1x8xf32>
    %c0_35 = arith.constant 0 : index
    %c0_36 = arith.constant 0 : index
    %48 = vector.load %arg14[%c0_35, %c0_36] : memref<1x8xf32, #tpu.memory_space<vmem>>, vector<1x8xf32>
    tpu.vector_store %arg14[%c0_35, %c0_36], %47 {strides = array<i32>} : memref<1x8xf32, #tpu.memory_space<vmem>>, vector<1x8xf32>,
    return
  }
  func.func @transform_0(%arg0: i32) -> (i32, i32) {
    %c0_i32 = arith.constant 0 : i32
    %c0_i32_0 = arith.constant 0 : i32
    return %arg0, %c0_i32 : i32, i32
  }
  func.func @transform_1(%arg0: i32) -> (i32, i32) {
    %c0_i32 = arith.constant 0 : i32
    %c0_i32_0 = arith.constant 0 : i32
    %c0_i32_1 = arith.constant 0 : i32
    return %c0_i32, %c0_i32_0 : i32, i32
  }
  func.func @transform_2(%arg0: i32) -> (i32, i32) {
    %c0_i32 = arith.constant 0 : i32
    %c0_i32_0 = arith.constant 0 : i32
    %c0_i32_1 = arith.constant 0 : i32
    return %c0_i32, %c0_i32_0 : i32, i32
  }
  func.func @transform_3(%arg0: i32) -> (i32, i32) {
    %c0_i32 = arith.constant 0 : i32
    %c0_i32_0 = arith.constant 0 : i32
    %c0_i32_1 = arith.constant 0 : i32
    return %c0_i32, %c0_i32_0 : i32, i32
  }
  func.func @transform_4(%arg0: i32) -> (i32, i32) {
    %c0_i32 = arith.constant 0 : i32
    %c0_i32_0 = arith.constant 0 : i32
    %c0_i32_1 = arith.constant 0 : i32
    return %c0_i32, %c0_i32_0 : i32, i32
  }
  func.func @transform_5(%arg0: i32) -> (i32, i32) {
    %c0_i32 = arith.constant 0 : i32
    %c0_i32_0 = arith.constant 0 : i32
    %c0_i32_1 = arith.constant 0 : i32
    return %c0_i32, %c0_i32_0 : i32, i32
  }
  func.func @transform_6(%arg0: i32) -> (i32, i32) {
    %c0_i32 = arith.constant 0 : i32
    %c0_i32_0 = arith.constant 0 : i32
    %c0_i32_1 = arith.constant 0 : i32
    return %c0_i32, %c0_i32_0 : i32, i32
  }
  func.func @transform_7(%arg0: i32) -> (i32, i32) {
    %c0_i32 = arith.constant 0 : i32
    %c0_i32_0 = arith.constant 0 : i32
    %c0_i32_1 = arith.constant 0 : i32
    return %c0_i32, %c0_i32_0 : i32, i32
  }
  func.func @transform_8(%arg0: i32) -> (i32, i32) {
    %c0_i32 = arith.constant 0 : i32
    %c0_i32_0 = arith.constant 0 : i32
    %c0_i32_1 = arith.constant 0 : i32
    return %c0_i32, %c0_i32_0 : i32, i32
  }
  func.func @transform_9(%arg0: i32) -> (i32, i32) {
    %c0_i32 = arith.constant 0 : i32
    %c0_i32_0 = arith.constant 0 : i32
    %c0_i32_1 = arith.constant 0 : i32
    return %c0_i32, %c0_i32_0 : i32, i32
  }
  func.func @transform_10(%arg0: i32) -> (i32, i32) {
    %c0_i32 = arith.constant 0 : i32
    %c0_i32_0 = arith.constant 0 : i32
    %c0_i32_1 = arith.constant 0 : i32
    return %c0_i32, %c0_i32_0 : i32, i32
  }
  func.func @transform_11(%arg0: i32) -> (i32, i32) {
    %c0_i32 = arith.constant 0 : i32
    %c0_i32_0 = arith.constant 0 : i32
    %c0_i32_1 = arith.constant 0 : i32
    return %c0_i32, %c0_i32_0 : i32, i32
  }
  func.func @transform_12(%arg0: i32) -> (i32, i32) {
    %c0_i32 = arith.constant 0 : i32
    %c0_i32_0 = arith.constant 0 : i32
    %c0_i32_1 = arith.constant 0 : i32
    return %c0_i32, %c0_i32_0 : i32, i32
  }
  func.func @transform_13(%arg0: i32) -> (i32, i32) {
    %c0_i32 = arith.constant 0 : i32
    %c0_i32_0 = arith.constant 0 : i32
    return %c0_i32, %arg0 : i32, i32
  }
}

</mosaic_0001>

<bundles_post_ra>
// kernel: tpu_custom_call.1
= control target key start
LH: loop header
LB: loop body
LE: loop exit
PB: predicated region body
PF: predicated region fallthrough
CT: control target
= control target key end

     0   :  { %s3959_s0 = inlined_call_operand.hbm [shape: f32[8,784], index: 0, kind: input, shape index: {}]   ;;  %s3960_s1 = inlined_call_operand.hbm [shape: bf16[784,512], index: 1, kind: input, shape index: {}]   ;;  %s3961_s2 = inlined_call_operand.hbm [shape: f32[1,512], index: 2, kind: input, shape index: {}]   ;;  %s3962_s3 = inlined_call_operand.hbm [shape: bf16[512,256], index: 3, kind: input, shape index: {}]   ;;  %s3963_s4 = inlined_call_operand.vmem [shape: f32[1,256], index: 4, kind: input, shape index: {}]   ;;  %s3964_s5 = inlined_call_operand.vmem [shape: bf16[256,128], index: 5, kind: input, shape index: {}]   ;;  %s3965_s6 = inlined_call_operand.hbm [shape: f32[1,128], index: 6, kind: input, shape index: {}]   ;;  %s3966_s7 = inlined_call_operand.vmem [shape: bf16[128,64], index: 7, kind: input, shape index: {}]   ;;  %s3967_s8 = inlined_call_operand.hbm [shape: f32[1,64], index: 8, kind: input, shape index: {}]   ;;  %s3968_s9 = inlined_call_operand.vmem [shape: bf16[64,32], index: 9, kind: input, shape index: {}]   ;;  %s3969_s10 = inlined_call_operand.vmem [shape: f32[1,32], index: 10, kind: input, shape index: {}]   ;;  %s3970_s11 = inlined_call_operand.vmem [shape: f32[1,32], index: 11, kind: input, shape index: {}]   ;;  %s3971_s12 = inlined_call_operand.<no memory space> [shape: f32[1,1], index: 12, kind: input, shape index: {}]   ;;  %s3972_s13 = inlined_call_operand.hbm [shape: f32[1,8], index: 13, kind: output, shape index: {}]  }
   0x1   :  { %v18_v0 = vstv %s3971_s12 }
   0x2   :  { %19 = vst [vmem:[#allocation2] sm:$0x1] %v18_v0 }
   0x3   :  { %20 = vsyncpa [#allocation4], 0 }
   0x4   :  { %21 = vsyncpa [#allocation7], 0 }
   0x5   :  { %22 = vsyncpa [#allocation10], 0 }
   0x6   :  { %23 = vsyncpa [#allocation13], 0 }
   0x7   :  { %24 = vsyncpa [#allocation5], 0  ;;  %s3640_s27 = smov [#allocation6]   ;;  %s3476_s14 = scalar_lea.hbm %s3960_s1, 25088 }
   0x8   :  { %s40_s28 = sshll.u32 %s3640_s27, 4  ;;  %p3477_p0 = scmp.ne.s32.totalorder %s3960_s1, %s3476_s14  ;;  %s41_s28 = int_to_ptr.vmem [resolvable:$true] %s40_s28 }
   0x9   :  { %p3480_p1 = scmp.lt.u32.totalorder %s3476_s14, %s3960_s1 }
   0xb   :  { %p3482_p2 = pnand %p3480_p1, %p3477_p0 }
   0xd   :  { %3485 = shalt.err (!%p3482_p2)
}
   0xe   :  { %s3486_s12 = scalar_lea.vmem %s41_s28, 25088  ;;  %p3491_p4 = scmp.lt.s32.totalorder %s41_s28, %s41_s28 }
   0xf   :  { %p3487_p3 = scmp.ne.s32.totalorder %s41_s28, %s3486_s12  ;;  %p3492_p5 = scmp.lt.s32.totalorder %s3486_s12, %s3486_s12 }
  0x11   :  { %p3493_p6 = por %p3492_p5, %p3491_p4 }
  0x13   :  { %p3494_p7 = pnand %p3493_p6, %p3487_p3 }
  0x15   :  { %3497 = shalt.err (!%p3494_p7)
}
  0x16   :  { %s3641_s19 = smov 256   ;;  %s3642_s20 = smov 16  }
  0x17   :  { %46 = dma.hbm_to_vmem [thread:$0]  %s3960_s1, 25088, %s41_s28, [#allocation7], %s3641_s19, %s3641_s19, %s3642_s20  }
  0x18   :  { %s3643_s23 = smov [#allocation9]   ;;  %s3498_s27 = scalar_lea.hbm %s3962_s3, 8192 }
  0x19   :  { %s62_s24 = sshll.u32 %s3643_s23, 4  ;;  %p3499_p8 = scmp.ne.s32.totalorder %s3962_s3, %s3498_s27  ;;  %s63_s24 = int_to_ptr.vmem [resolvable:$true] %s62_s24 }
  0x1a   :  { %p3502_p9 = scmp.lt.u32.totalorder %s3498_s27, %s3962_s3 }
  0x1c   :  { %p3504_p10 = pnand %p3502_p9, %p3499_p8 }
  0x1e   :  { %3507 = shalt.err (!%p3504_p10)
}
  0x1f   :  { %s3508_s16 = scalar_lea.vmem %s63_s24, 8192  ;;  %p3513_p12 = scmp.lt.s32.totalorder %s63_s24, %s63_s24 }
  0x20   :  { %p3509_p11 = scmp.ne.s32.totalorder %s63_s24, %s3508_s16  ;;  %p3514_p13 = scmp.lt.s32.totalorder %s3508_s16, %s3508_s16 }
  0x22   :  { %p3515_p0 = por %p3514_p13, %p3513_p12 }
  0x24   :  { %p3516_p1 = pnand %p3515_p0, %p3509_p11 }
  0x26   :  { %3519 = shalt.err (!%p3516_p1)
}
  0x27   :  { %s3644_s1 = smov 128   ;;  %s3645_s28 = smov 8  }
  0x28   :  { %68 = dma.hbm_to_vmem [thread:$0]  %s3962_s3, 8192, %s63_s24, [#allocation10], %s3644_s1, %s3644_s1, %s3645_s28  }
  0x29   :  { %s3646_s12 = smov [#allocation3]   ;;  %s3647_s20 = smov [#allocation8]  }
  0x2a   :  { %s31_s19 = sshll.u32 %s3646_s12, 4  ;;  %s53_s21 = sshll.u32 %s3647_s20, 4  ;;  %s32_s19 = int_to_ptr.vmem [resolvable:$true] %s31_s19  ;;  %s54_s21 = int_to_ptr.vmem [resolvable:$true] %s53_s21 }
  0x2b   :  { %s3520_s25 = scalar_lea.hbm %s3959_s0, 896 }
  0x2c   :  { %p3521_p2 = scmp.ne.s32.totalorder %s3959_s0, %s3520_s25  ;;  %p3524_p3 = scmp.lt.u32.totalorder %s3520_s25, %s3959_s0 }
  0x2e   :  { %p3526_p4 = pnand %p3524_p3, %p3521_p2 }
  0x30   :  { %3529 = shalt.err (!%p3526_p4)
}
  0x31   :  { %s3530_s3 = scalar_lea.vmem %s32_s19, 896  ;;  %p3535_p6 = scmp.lt.s32.totalorder %s32_s19, %s32_s19 }
  0x32   :  { %p3531_p5 = scmp.ne.s32.totalorder %s32_s19, %s3530_s3  ;;  %p3536_p7 = scmp.lt.s32.totalorder %s3530_s3, %s3530_s3 }
  0x34   :  { %p3537_p8 = por %p3536_p7, %p3535_p6 }
  0x36   :  { %p3538_p9 = pnand %p3537_p8, %p3531_p5 }
  0x38   :  { %3541 = shalt.err (!%p3538_p9)
}
  0x39   :  { %34 = dma.hbm_to_vmem [thread:$0]  %s3959_s0, 896, %s32_s19, [#allocation4]  }
  0x3a   :  { %s3542_s1 = scalar_lea.hbm %s3961_s2, 64 }
  0x3b   :  { %p3543_p10 = scmp.ne.s32.totalorder %s3961_s2, %s3542_s1  ;;  %p3546_p11 = scmp.lt.u32.totalorder %s3542_s1, %s3961_s2 }
  0x3d   :  { %p3548_p12 = pnand %p3546_p11, %p3543_p10 }
  0x3f   :  { %3551 = shalt.err (!%p3548_p12)
}
  0x40   :  { %s3552_s20 = scalar_lea.vmem %s54_s21, 64  ;;  %p3557_p0 = scmp.lt.s32.totalorder %s54_s21, %s54_s21 }
  0x41   :  { %p3553_p13 = scmp.ne.s32.totalorder %s54_s21, %s3552_s20  ;;  %p3558_p1 = scmp.lt.s32.totalorder %s3552_s20, %s3552_s20 }
  0x43   :  { %p3559_p2 = por %p3558_p1, %p3557_p0 }
  0x45   :  { %p3560_p3 = pnand %p3559_p2, %p3553_p13 }
  0x47   :  { %3563 = shalt.err (!%p3560_p3)
}
  0x48   :  { %56 = dma.hbm_to_vmem [thread:$0]  %s3961_s2, 64, %s54_s21, [#allocation7]  }
  0x49   :  { %s3648_s22 = smov [#allocation11]   ;;  %s3649_s25 = smov [#allocation12]  }
  0x4a   :  { %s79_s23 = sshll.u32 %s3648_s22, 4  ;;  %s91_s26 = sshll.u32 %s3649_s25, 4  ;;  %s80_s23 = int_to_ptr.vmem [resolvable:$true] %s79_s23  ;;  %s92_s26 = int_to_ptr.vmem [resolvable:$true] %s91_s26 }
  0x4b   :  { %s3564_s30 = scalar_lea.hbm %s3965_s6, 16 }
  0x4c   :  { %p3565_p4 = scmp.ne.s32.totalorder %s3965_s6, %s3564_s30  ;;  %p3568_p5 = scmp.lt.u32.totalorder %s3564_s30, %s3965_s6 }
  0x4e   :  { %p3570_p6 = pnand %p3568_p5, %p3565_p4 }
  0x50   :  { %3573 = shalt.err (!%p3570_p6)
}
  0x51   :  { %s3574_s2 = scalar_lea.vmem %s80_s23, 16  ;;  %s3578_s21 = scalar_lea.vmem %s80_s23, 32 }
  0x52   :  { %p3575_p7 = scmp.ne.s32.totalorder %s80_s23, %s3574_s2  ;;  %p3579_p8 = scmp.lt.s32.totalorder %s80_s23, %s80_s23 }
  0x53   :  { %p3580_p9 = scmp.lt.s32.totalorder %s3578_s21, %s3574_s2 }
  0x55   :  { %p3581_p10 = por %p3580_p9, %p3579_p8 }
  0x57   :  { %p3582_p11 = pnand %p3581_p10, %p3575_p7 }
  0x59   :  { %3585 = shalt.err (!%p3582_p11)
}
  0x5a   :  { %82 = dma.hbm_to_vmem [thread:$0]  %s3965_s6, 16, %s80_s23, [#allocation10]  }
  0x5b   :  { %s3586_s18 = scalar_lea.hbm %s3967_s8, 16 }
  0x5c   :  { %p3587_p12 = scmp.ne.s32.totalorder %s3967_s8, %s3586_s18  ;;  %p3590_p13 = scmp.lt.u32.totalorder %s3586_s18, %s3967_s8 }
  0x5e   :  { %p3592_p0 = pnand %p3590_p13, %p3587_p12 }
  0x60   :  { %3595 = shalt.err (!%p3592_p0)
}
  0x61   :  { %s3596_s22 = scalar_lea.vmem %s92_s26, 16  ;;  %s3600_s25 = scalar_lea.vmem %s92_s26, 32 }
  0x62   :  { %p3597_p1 = scmp.ne.s32.totalorder %s92_s26, %s3596_s22  ;;  %p3601_p2 = scmp.lt.s32.totalorder %s92_s26, %s92_s26 }
  0x63   :  { %p3602_p3 = scmp.lt.s32.totalorder %s3600_s25, %s3596_s22 }
  0x65   :  { %p3603_p4 = por %p3602_p3, %p3601_p2 }
  0x67   :  { %p3604_p5 = pnand %p3603_p4, %p3597_p1 }
  0x69   :  { %3607 = shalt.err (!%p3604_p5)
}
  0x6a   :  { %94 = dma.hbm_to_vmem [thread:$0]  %s3967_s8, 16, %s92_s26, [#allocation13]  }
  0x6b   :  { %3630 = dma.done.wait [#allocation4], 896  }
  0x6c   :  { %3631 = vsyncadd [#allocation4], 4294966400 }
  0x6d   :  { %3632 = dma.done.wait [#allocation7], 25152  }
  0x6e   :  { %3633 = vsyncadd [#allocation7], 4294942144 }
  0x6f   :  { %3634 = dma.done.wait [#allocation10], 8208  }
  0x70   :  { %3635 = vsyncadd [#allocation10], 4294959088 }
  0x71   :  { %3636 = dma.done.wait [#allocation13], 16  }
  0x72   :  { %3637 = vsyncadd [#allocation13], 4294967280  ;;  %v3650_v1 = vmov 0   ;;  %v3058_v2 = vld [vmem:[#allocation6 + $0x4] ss:$16 sps:$4 sm:$0xff]   ;;  %v128_v10 = vld [vmem:[#allocation3 + $0x30] sm:$0xff] }
  0x73   :  { %1493 = vmatprep.mubr.bf16.mxu1 %v3650_v1  ;;  %3057 = vset.pattern.permute.xlu0 %v3650_v1  ;;  %v3060_v3 = vld [vmem:[#allocation6 + $0x604] ss:$16 sps:$4 sm:$0xff]   ;;  %v3062_v4 = vld [vmem:[#allocation6] ss:$16 sps:$4 sm:$0xff]   ;;  %v3066_v7 = vld [vmem:[#allocation6 + $0x8] ss:$16 sps:$4 sm:$0xff]   ;;  %v3801_v11 = vpack.c.bf16 %v128_v10, %v128_v10 }
  0x74   :  { %1338 = vmatprep.subr.bf16.mxu0 %v3058_v2  ;;  %v3063_v5 = vld [vmem:[#allocation6 + $0x600] ss:$16 sps:$4 sm:$0xff]   ;;  %1461 = vmatprep.subr.bf16.mxu1 %v3060_v3  ;;  %v3064_v6 = vld [vmem:[#allocation6 + $0x24] ss:$16 sps:$4 sm:$0xff]   ;;  %v3068_v8 = vld [vmem:[#allocation6 + $0xc] ss:$16 sps:$4 sm:$0xff]  }
  0x75   :  { %1339 = vmatpush1.bf16.msra.mxu0 %v3062_v4  ;;  %1462 = vmatpush1.bf16.msra.mxu1 %v3063_v5  ;;  %v3069_v9 = vld [vmem:[#allocation6 + $0x20] ss:$16 sps:$4 sm:$0xff]   ;;  %vm1334_vm0 = vcmask 130048   ;;  %v3070_v12 = vld [vmem:[#allocation6 + $0x44] ss:$16 sps:$4 sm:$0xff]   ;;  %vm3652_vm1 = vmmov 0  }
  0x76   :  { %1340 = vmatprep.subr.bf16.mxu0 %v3064_v6  ;;  %1502 = vmatprep.subr.bf16.mxu1 %v3068_v8  ;;  %v3072_v13 = vld [vmem:[#allocation6 + $0x28] ss:$16 sps:$4 sm:$0xff]   ;;  %v3074_v14 = vld [vmem:[#allocation6 + $0x2c] ss:$16 sps:$4 sm:$0xff]   ;;  %v3075_v15 = vld [vmem:[#allocation6 + $0x40] ss:$16 sps:$4 sm:$0xff]  }
  0x77   :  { %v3076_v16 = vld [vmem:[#allocation6 + $0x64] ss:$16 sps:$4 sm:$0xff]   ;;  %v3080_v17 = vld [vmem:[#allocation6 + $0x4c] ss:$16 sps:$4 sm:$0xff]   ;;  %v3081_v18 = vld [vmem:[#allocation6 + $0x60] ss:$16 sps:$4 sm:$0xff]  }
  0x78   :  { %2836 = vmatmul.mubr.msk.bf16.vlgmr.msra.gmra.mrb[0].mxu1 %vm1334_vm0, %v3801_v11  ;;  %v3078_v19 = vld [vmem:[#allocation6 + $0x48] ss:$16 sps:$4 sm:$0xff]   ;;  %v3082_v20 = vld [vmem:[#allocation6 + $0x84] ss:$16 sps:$4 sm:$0xff]   ;;  %v3086_v21 = vld [vmem:[#allocation6 + $0x6c] ss:$16 sps:$4 sm:$0xff]  }
  0x79   :  { %1341 = vmatpush1.bf16.msra.mxu0 %v3069_v9  ;;  %1503 = vmatpush1.bf16.msra.mxu1 %v3066_v7  ;;  %v3084_v22 = vld [vmem:[#allocation6 + $0x68] ss:$16 sps:$4 sm:$0xff]   ;;  %v3087_v23 = vld [vmem:[#allocation6 + $0x80] ss:$16 sps:$4 sm:$0xff]   ;;  %v3088_v24 = vld [vmem:[#allocation6 + $0xa4] ss:$16 sps:$4 sm:$0xff]  }
  0x7a   :  { %1342 = vmatprep.subr.bf16.mxu0 %v3070_v12  ;;  %1504 = vmatprep.subr.bf16.mxu1 %v3074_v14  ;;  %v3092_v25 = vld [vmem:[#allocation6 + $0x8c] ss:$16 sps:$4 sm:$0xff]   ;;  %v3093_v26 = vld [vmem:[#allocation6 + $0xa0] ss:$16 sps:$4 sm:$0xff]   ;;  %v3090_v27 = vld [vmem:[#allocation6 + $0x88] ss:$16 sps:$4 sm:$0xff]  }
  0x7b   :  { %v3094_v28 = vld [vmem:[#allocation6 + $0xc4] ss:$16 sps:$4 sm:$0xff]   ;;  %v3098_v29 = vld [vmem:[#allocation6 + $0xac] ss:$16 sps:$4 sm:$0xff]   ;;  %v3096_v30 = vld [vmem:[#allocation6 + $0xa8] ss:$16 sps:$4 sm:$0xff]  }
  0x7c   :  { %v3099_v31 = vld [vmem:[#allocation6 + $0xc0] ss:$16 sps:$4 sm:$0xff]   ;;  %v3100_v32 = vld [vmem:[#allocation6 + $0xe4] ss:$16 sps:$4 sm:$0xff]   ;;  %v3104_v33 = vld [vmem:[#allocation6 + $0xcc] ss:$16 sps:$4 sm:$0xff]  }
  0x7d   :  { %1343 = vmatpush1.bf16.msra.mxu0 %v3075_v15  ;;  %1505 = vmatpush1.bf16.msra.mxu1 %v3072_v13  ;;  %v3105_v34 = vld [vmem:[#allocation6 + $0xe0] ss:$16 sps:$4 sm:$0xff]   ;;  %v3102_v35 = vld [vmem:[#allocation6 + $0xc8] ss:$16 sps:$4 sm:$0xff]   ;;  %v3106_v36 = vld [vmem:[#allocation6 + $0x104] ss:$16 sps:$4 sm:$0xff]  }
  0x7e   :  { %1344 = vmatprep.subr.bf16.mxu0 %v3076_v16  ;;  %1506 = vmatprep.subr.bf16.mxu1 %v3080_v17  ;;  %v3110_v37 = vld [vmem:[#allocation6 + $0xec] ss:$16 sps:$4 sm:$0xff]   ;;  %v3108_v38 = vld [vmem:[#allocation6 + $0xe8] ss:$16 sps:$4 sm:$0xff]   ;;  %v3111_v39 = vld [vmem:[#allocation6 + $0x100] ss:$16 sps:$4 sm:$0xff]  }
  0x7f   :  { %v3112_v40 = vld [vmem:[#allocation6 + $0x124] ss:$16 sps:$4 sm:$0xff]   ;;  %v3116_v41 = vld [vmem:[#allocation6 + $0x10c] ss:$16 sps:$4 sm:$0xff]   ;;  %v3117_v42 = vld [vmem:[#allocation6 + $0x120] ss:$16 sps:$4 sm:$0xff]  }
  0x80   :  { %v3114_v43 = vld [vmem:[#allocation6 + $0x108] ss:$16 sps:$4 sm:$0xff]   ;;  %v3118_v44 = vld [vmem:[#allocation6 + $0x144] ss:$16 sps:$4 sm:$0xff]   ;;  %v3122_v45 = vld [vmem:[#allocation6 + $0x12c] ss:$16 sps:$4 sm:$0xff]  }
  0x81   :  { %1345 = vmatpush1.bf16.msra.mxu0 %v3081_v18  ;;  %1507 = vmatpush1.bf16.msra.mxu1 %v3078_v19  ;;  %v3120_v46 = vld [vmem:[#allocation6 + $0x128] ss:$16 sps:$4 sm:$0xff]   ;;  %v3123_v47 = vld [vmem:[#allocation6 + $0x140] ss:$16 sps:$4 sm:$0xff]   ;;  %v3124_v48 = vld [vmem:[#allocation6 + $0x164] ss:$16 sps:$4 sm:$0xff]  }
  0x82   :  { %1346 = vmatprep.subr.bf16.mxu0 %v3082_v20  ;;  %1508 = vmatprep.subr.bf16.mxu1 %v3086_v21  ;;  %v3128_v49 = vld [vmem:[#allocation6 + $0x14c] ss:$16 sps:$4 sm:$0xff]   ;;  %v123_v50 = vld [vmem:[#allocation3 + $0x8] sm:$0xff]  ;;  %v3126_v53 = vld [vmem:[#allocation6 + $0x148] ss:$16 sps:$4 sm:$0xff]   ;;  %vm2485_vm2 = vcmask 523264  }
  0x83   :  { %v3129_v51 = vld [vmem:[#allocation6 + $0x160] ss:$16 sps:$4 sm:$0xff]   ;;  %v130_v52 = vpack.c.bf16 %v123_v50, %v123_v50  ;;  %v3130_v54 = vld [vmem:[#allocation6 + $0x184] ss:$16 sps:$4 sm:$0xff]   ;;  %v3134_v55 = vld [vmem:[#allocation6 + $0x16c] ss:$16 sps:$4 sm:$0xff]  }
  0x84   :  { %v3132_v56 = vld [vmem:[#allocation6 + $0x168] ss:$16 sps:$4 sm:$0xff]   ;;  %v3135_v57 = vld [vmem:[#allocation6 + $0x180] ss:$16 sps:$4 sm:$0xff]   ;;  %v3136_v58 = vld [vmem:[#allocation6 + $0x1a4] ss:$16 sps:$4 sm:$0xff]  }
  0x85   :  { %1347 = vmatpush1.bf16.msra.mxu0 %v3087_v23  ;;  %1509 = vmatpush1.bf16.msra.mxu1 %v3084_v22  ;;  %v3140_v59 = vld [vmem:[#allocation6 + $0x18c] ss:$16 sps:$4 sm:$0xff]   ;;  %v3138_v60 = vld [vmem:[#allocation6 + $0x188] ss:$16 sps:$4 sm:$0xff]   ;;  %v3141_v61 = vld [vmem:[#allocation6 + $0x1a0] ss:$16 sps:$4 sm:$0xff]  }
  0x86   :  { %1348 = vmatprep.subr.bf16.mxu0 %v3088_v24  ;;  %1510 = vmatprep.subr.bf16.mxu1 %v3092_v25  ;;  %v3142_v62 = vld [vmem:[#allocation6 + $0x1c4] ss:$16 sps:$4 sm:$0xff]   ;;  %v3146_v63 = vld [vmem:[#allocation6 + $0x1ac] ss:$16 sps:$4 sm:$0xff]   ;;  %v3144_v0 = vld [vmem:[#allocation6 + $0x1a8] ss:$16 sps:$4 sm:$0xff]  }
  0x87   :  { %1370 = vmatprep.mubr.bf16.mxu0 %v130_v52  ;;  %1534 = vmatprep.mubr.bf16.mxu1 %v130_v52  ;;  %v3147_v2 = vld [vmem:[#allocation6 + $0x1c0] ss:$16 sps:$4 sm:$0xff]   ;;  %v3148_v3 = vld [vmem:[#allocation6 + $0x1e4] ss:$16 sps:$4 sm:$0xff]   ;;  %v3152_v4 = vld [vmem:[#allocation6 + $0x1cc] ss:$16 sps:$4 sm:$0xff]  }
  0x88   :  { %v3150_v5 = vld [vmem:[#allocation6 + $0x1c8] ss:$16 sps:$4 sm:$0xff]   ;;  %v3153_v6 = vld [vmem:[#allocation6 + $0x1e0] ss:$16 sps:$4 sm:$0xff]   ;;  %v3156_v8 = vld [vmem:[#allocation6 + $0x204] ss:$16 sps:$4 sm:$0xff]  }
  0x89   :  { %1349 = vmatpush1.bf16.msra.mxu0 %v3093_v26  ;;  %1511 = vmatpush1.bf16.msra.mxu1 %v3090_v27  ;;  %v122_v7 = vld [vmem:[#allocation3] sm:$0xff]  ;;  %v3154_v12 = vld [vmem:[#allocation6 + $0x200] ss:$16 sps:$4 sm:$0xff]   ;;  %v3162_v14 = vld [vmem:[#allocation6 + $0x224] ss:$16 sps:$4 sm:$0xff]   ;;  %vm2543_vm3 = vcmask 261120  }
  0x8a   :  { %1350 = vmatprep.subr.bf16.mxu0 %v3094_v28  ;;  %1512 = vmatprep.subr.bf16.mxu1 %v3098_v29  ;;  %v3159_v9 = vld [vmem:[#allocation6 + $0x1ec] ss:$16 sps:$4 sm:$0xff]   ;;  %v129_v10 = vpack.c.bf16 %v122_v7, %v122_v7  ;;  %v3157_v13 = vld [vmem:[#allocation6 + $0x1e8] ss:$16 sps:$4 sm:$0xff]   ;;  %v3160_v16 = vld [vmem:[#allocation6 + $0x220] ss:$16 sps:$4 sm:$0xff]  }
  0x8b   :  { %v3165_v15 = vld [vmem:[#allocation6 + $0x20c] ss:$16 sps:$4 sm:$0xff]   ;;  %v3163_v17 = vld [vmem:[#allocation6 + $0x208] ss:$16 sps:$4 sm:$0xff]   ;;  %v3168_v18 = vld [vmem:[#allocation6 + $0x244] ss:$16 sps:$4 sm:$0xff]  }
  0x8c   :  { %v3171_v19 = vld [vmem:[#allocation6 + $0x22c] ss:$16 sps:$4 sm:$0xff]   ;;  %v3166_v20 = vld [vmem:[#allocation6 + $0x240] ss:$16 sps:$4 sm:$0xff]   ;;  %v3169_v21 = vld [vmem:[#allocation6 + $0x228] ss:$16 sps:$4 sm:$0xff]  }
  0x8d   :  { %1351 = vmatpush1.bf16.msra.mxu0 %v3099_v31  ;;  %1513 = vmatpush1.bf16.msra.mxu1 %v3096_v30  ;;  %v3174_v22 = vld [vmem:[#allocation6 + $0x264] ss:$16 sps:$4 sm:$0xff]   ;;  %v3177_v23 = vld [vmem:[#allocation6 + $0x24c] ss:$16 sps:$4 sm:$0xff]   ;;  %v3172_v24 = vld [vmem:[#allocation6 + $0x260] ss:$16 sps:$4 sm:$0xff]  }
  0x8e   :  { %1352 = vmatprep.subr.bf16.mxu0 %v3100_v32  ;;  %1514 = vmatprep.subr.bf16.mxu1 %v3104_v33  ;;  %v3175_v25 = vld [vmem:[#allocation6 + $0x248] ss:$16 sps:$4 sm:$0xff]   ;;  %v3180_v26 = vld [vmem:[#allocation6 + $0x284] ss:$16 sps:$4 sm:$0xff]   ;;  %v3183_v27 = vld [vmem:[#allocation6 + $0x26c] ss:$16 sps:$4 sm:$0xff]  }
  0x8f   :  { %v3178_v28 = vld [vmem:[#allocation6 + $0x280] ss:$16 sps:$4 sm:$0xff]   ;;  %v3181_v29 = vld [vmem:[#allocation6 + $0x268] ss:$16 sps:$4 sm:$0xff]   ;;  %v3186_v30 = vld [vmem:[#allocation6 + $0x2a4] ss:$16 sps:$4 sm:$0xff]  }
  0x90   :  { %v3189_v31 = vld [vmem:[#allocation6 + $0x28c] ss:$16 sps:$4 sm:$0xff]   ;;  %v3184_v32 = vld [vmem:[#allocation6 + $0x2a0] ss:$16 sps:$4 sm:$0xff]   ;;  %v3187_v33 = vld [vmem:[#allocation6 + $0x288] ss:$16 sps:$4 sm:$0xff]  }
  0x91   :  { %1353 = vmatpush1.bf16.msra.mxu0 %v3105_v34  ;;  %1515 = vmatpush1.bf16.msra.mxu1 %v3102_v35  ;;  %v3192_v34 = vld [vmem:[#allocation6 + $0x2c4] ss:$16 sps:$4 sm:$0xff]   ;;  %v3195_v35 = vld [vmem:[#allocation6 + $0x2ac] ss:$16 sps:$4 sm:$0xff]   ;;  %v3208_v50 = vld [vmem:[#allocation6 + $0x320] ss:$16 sps:$4 sm:$0xff]  }
  0x92   :  { %1354 = vmatprep.subr.bf16.mxu0 %v3106_v36  ;;  %1516 = vmatprep.subr.bf16.mxu1 %v3110_v37  ;;  %v125_v36 = vld [vmem:[#allocation3 + $0x18] sm:$0xff]  ;;  %vm2620_vm4 = vcmask 57344  }
  0x93   :  { %v132_v37 = vpack.c.bf16 %v125_v36, %v125_v36  ;;  %v3216_v52 = vld [vmem:[#allocation6 + $0x344] ss:$16 sps:$4 sm:$0xff]   ;;  %v3238_v7 = vld [vmem:[#allocation6 + $0x3c0] ss:$16 sps:$4 sm:$0xff]  }
  0x94   :  { %v3274_v36 = vld [vmem:[#allocation6 + $0x480] ss:$16 sps:$4 sm:$0xff]  }
  0x95   :  { %1355 = vmatpush1.bf16.msra.mxu0 %v3111_v39  ;;  %1517 = vmatpush1.bf16.msra.mxu1 %v3108_v38  ;;  %v3190_v38 = vld [vmem:[#allocation6 + $0x2c0] ss:$16 sps:$4 sm:$0xff]   ;;  %v3193_v39 = vld [vmem:[#allocation6 + $0x2a8] ss:$16 sps:$4 sm:$0xff]  }
  0x96   :  { %1356 = vmatprep.subr.bf16.mxu0 %v3112_v40  ;;  %1518 = vmatprep.subr.bf16.mxu1 %v3116_v41  ;;  %v3198_v40 = vld [vmem:[#allocation6 + $0x2e4] ss:$16 sps:$4 sm:$0xff]   ;;  %v3201_v41 = vld [vmem:[#allocation6 + $0x2cc] ss:$16 sps:$4 sm:$0xff]  }
  0x99   :  { %1357 = vmatpush1.bf16.msra.mxu0 %v3117_v42  ;;  %1519 = vmatpush1.bf16.msra.mxu1 %v3114_v43  ;;  %v3196_v42 = vld [vmem:[#allocation6 + $0x2e0] ss:$16 sps:$4 sm:$0xff]   ;;  %v3199_v43 = vld [vmem:[#allocation6 + $0x2c8] ss:$16 sps:$4 sm:$0xff]  }
  0x9a   :  { %1358 = vmatprep.subr.bf16.mxu0 %v3118_v44  ;;  %1520 = vmatprep.subr.bf16.mxu1 %v3122_v45  ;;  %v3204_v44 = vld [vmem:[#allocation6 + $0x304] ss:$16 sps:$4 sm:$0xff]   ;;  %v3207_v45 = vld [vmem:[#allocation6 + $0x2ec] ss:$16 sps:$4 sm:$0xff]  }
  0x9d   :  { %1359 = vmatpush1.bf16.msra.mxu0 %v3123_v47  ;;  %1521 = vmatpush1.bf16.msra.mxu1 %v3120_v46  ;;  %v3202_v46 = vld [vmem:[#allocation6 + $0x300] ss:$16 sps:$4 sm:$0xff]   ;;  %v3205_v47 = vld [vmem:[#allocation6 + $0x2e8] ss:$16 sps:$4 sm:$0xff]  }
  0x9e   :  { %1360 = vmatprep.subr.bf16.mxu0 %v3124_v48  ;;  %1522 = vmatprep.subr.bf16.mxu1 %v3128_v49  ;;  %v3210_v48 = vld [vmem:[#allocation6 + $0x324] ss:$16 sps:$4 sm:$0xff]   ;;  %v3213_v49 = vld [vmem:[#allocation6 + $0x30c] ss:$16 sps:$4 sm:$0xff]  }
  0xa1   :  { %1361 = vmatpush1.bf16.msra.mxu0 %v3129_v51  ;;  %1523 = vmatpush1.bf16.msra.mxu1 %v3126_v53  ;;  %v3211_v51 = vld [vmem:[#allocation6 + $0x308] ss:$16 sps:$4 sm:$0xff]   ;;  %v3219_v53 = vld [vmem:[#allocation6 + $0x32c] ss:$16 sps:$4 sm:$0xff]  }
  0xa2   :  { %1362 = vmatprep.subr.bf16.mxu0 %v3130_v54  ;;  %1524 = vmatprep.subr.bf16.mxu1 %v3134_v55  ;;  %v3214_v54 = vld [vmem:[#allocation6 + $0x340] ss:$16 sps:$4 sm:$0xff]   ;;  %v3217_v55 = vld [vmem:[#allocation6 + $0x328] ss:$16 sps:$4 sm:$0xff]  }
  0xa5   :  { %1363 = vmatpush1.bf16.msra.mxu0 %v3135_v57  ;;  %1525 = vmatpush1.bf16.msra.mxu1 %v3132_v56  ;;  %v3222_v56 = vld [vmem:[#allocation6 + $0x364] ss:$16 sps:$4 sm:$0xff]   ;;  %v3225_v57 = vld [vmem:[#allocation6 + $0x34c] ss:$16 sps:$4 sm:$0xff]  }
  0xa6   :  { %1364 = vmatprep.subr.bf16.mxu0 %v3136_v58  ;;  %1526 = vmatprep.subr.bf16.mxu1 %v3140_v59  ;;  %v3220_v58 = vld [vmem:[#allocation6 + $0x360] ss:$16 sps:$4 sm:$0xff]   ;;  %v3223_v59 = vld [vmem:[#allocation6 + $0x348] ss:$16 sps:$4 sm:$0xff]  }
  0xa9   :  { %1365 = vmatpush1.bf16.msra.mxu0 %v3141_v61  ;;  %1527 = vmatpush1.bf16.msra.mxu1 %v3138_v60  ;;  %v3228_v60 = vld [vmem:[#allocation6 + $0x384] ss:$16 sps:$4 sm:$0xff]   ;;  %v3231_v61 = vld [vmem:[#allocation6 + $0x36c] ss:$16 sps:$4 sm:$0xff]  }
  0xaa   :  { %1366 = vmatprep.subr.bf16.mxu0 %v3142_v62  ;;  %1528 = vmatprep.subr.bf16.mxu1 %v3146_v63  ;;  %v3226_v62 = vld [vmem:[#allocation6 + $0x380] ss:$16 sps:$4 sm:$0xff]   ;;  %v3229_v63 = vld [vmem:[#allocation6 + $0x368] ss:$16 sps:$4 sm:$0xff]  }
  0xad   :  { %1367 = vmatpush1.bf16.msra.mxu0 %v3147_v2  ;;  %1529 = vmatpush1.bf16.msra.mxu1 %v3144_v0  ;;  %v3234_v0 = vld [vmem:[#allocation6 + $0x3a4] ss:$16 sps:$4 sm:$0xff]   ;;  %v3237_v2 = vld [vmem:[#allocation6 + $0x38c] ss:$16 sps:$4 sm:$0xff]  }
  0xae   :  { %1368 = vmatprep.subr.bf16.mxu0 %v3148_v3  ;;  %1530 = vmatprep.subr.bf16.mxu1 %v3152_v4  ;;  %v3232_v3 = vld [vmem:[#allocation6 + $0x3a0] ss:$16 sps:$4 sm:$0xff]   ;;  %v3235_v4 = vld [vmem:[#allocation6 + $0x388] ss:$16 sps:$4 sm:$0xff]  }
  0xb1   :  { %1369 = vmatpush1.bf16.msra.mxu0 %v3153_v6  ;;  %1531 = vmatpush1.bf16.msra.mxu1 %v3150_v5  ;;  %v3240_v5 = vld [vmem:[#allocation6 + $0x3c4] ss:$16 sps:$4 sm:$0xff]   ;;  %v3243_v6 = vld [vmem:[#allocation6 + $0x3ac] ss:$16 sps:$4 sm:$0xff]  }
  0xb2   :  { %1379 = vmatprep.subr.bf16.mxu0 %v3156_v8  ;;  %1532 = vmatprep.subr.bf16.mxu1 %v3159_v9  ;;  %v3241_v8 = vld [vmem:[#allocation6 + $0x3a8] ss:$16 sps:$4 sm:$0xff]   ;;  %v3246_v9 = vld [vmem:[#allocation6 + $0x3e4] ss:$16 sps:$4 sm:$0xff]  }
  0xb4   :  { %1371 = vmatmul.mubr.bf16.vlgmr.msra.gmra.mrb[0].mxu0 %v129_v10 }
  0xb5   :  { %1380 = vmatpush1.bf16.msra.mxu0 %v3154_v12  ;;  %1533 = vmatpush1.bf16.msra.mxu1 %v3157_v13  ;;  %v3244_v12 = vld [vmem:[#allocation6 + $0x3e0] ss:$16 sps:$4 sm:$0xff]   ;;  %v124_v13 = vld [vmem:[#allocation3 + $0x10] sm:$0xff] }
  0xb6   :  { %1381 = vmatprep.subr.bf16.mxu0 %v3162_v14  ;;  %1543 = vmatprep.subr.bf16.mxu1 %v3165_v15  ;;  %v3247_v14 = vld [vmem:[#allocation6 + $0x3c8] ss:$16 sps:$4 sm:$0xff]   ;;  %v3252_v15 = vld [vmem:[#allocation6 + $0x404] ss:$16 sps:$4 sm:$0xff]  }
  0xb7   :  { %1411 = vmatprep.mubr.bf16.mxu0 %v132_v37 }
  0xb8   :  { %1535 = vmatmul.mubr.bf16.vlgmr.msra.gmra.mrb[4].mxu1 %v129_v10  ;;  %v3249_v10 = vld [vmem:[#allocation6 + $0x3cc] ss:$16 sps:$4 sm:$0xff]  }
  0xb9   :  { %1382 = vmatpush1.bf16.msra.mxu0 %v3160_v16  ;;  %1544 = vmatpush1.bf16.msra.mxu1 %v3163_v17  ;;  %v3255_v16 = vld [vmem:[#allocation6 + $0x3ec] ss:$16 sps:$4 sm:$0xff]   ;;  %v131_v17 = vpack.c.bf16 %v124_v13, %v124_v13 }
  0xba   :  { %1383 = vmatprep.subr.bf16.mxu0 %v3168_v18  ;;  %1545 = vmatprep.subr.bf16.mxu1 %v3171_v19  ;;  %v3250_v18 = vld [vmem:[#allocation6 + $0x400] ss:$16 sps:$4 sm:$0xff]   ;;  %v3253_v19 = vld [vmem:[#allocation6 + $0x3e8] ss:$16 sps:$4 sm:$0xff]   ;;  %v3339_v13 = vld [vmem:[#allocation6 + $0x5ac] ss:$16 sps:$4 sm:$0xff]  }
  0xbb   :  { %1575 = vmatprep.mubr.bf16.mxu1 %v132_v37  ;;  %v3277_v37 = vld [vmem:[#allocation6 + $0x468] ss:$16 sps:$4 sm:$0xff]  }
  0xbd   :  { %1384 = vmatpush1.bf16.msra.mxu0 %v3166_v20  ;;  %1546 = vmatpush1.bf16.msra.mxu1 %v3169_v21  ;;  %v3258_v20 = vld [vmem:[#allocation6 + $0x424] ss:$16 sps:$4 sm:$0xff]  }
  0xbe   :  { %1385 = vmatprep.subr.bf16.mxu0 %v3174_v22  ;;  %1547 = vmatprep.subr.bf16.mxu1 %v3177_v23  ;;  %v127_v21 = vld [vmem:[#allocation3 + $0x28] sm:$0xff]  ;;  %v3261_v22 = vld [vmem:[#allocation6 + $0x40c] ss:$16 sps:$4 sm:$0xff]  }
  0xbf   :  { %v134_v23 = vpack.c.bf16 %v127_v21, %v127_v21  ;;  %v3354_v21 = vld [vmem:[#allocation9 + $0x4] ss:$8 sps:$4 sm:$0xff]  }
  0xc1   :  { %1386 = vmatpush1.bf16.msra.mxu0 %v3172_v24  ;;  %1548 = vmatpush1.bf16.msra.mxu1 %v3175_v25  ;;  %v3256_v24 = vld [vmem:[#allocation6 + $0x420] ss:$16 sps:$4 sm:$0xff]   ;;  %v3259_v25 = vld [vmem:[#allocation6 + $0x408] ss:$16 sps:$4 sm:$0xff]  }
  0xc2   :  { %1387 = vmatprep.subr.bf16.mxu0 %v3180_v26  ;;  %1549 = vmatprep.subr.bf16.mxu1 %v3183_v27  ;;  %v3264_v26 = vld [vmem:[#allocation6 + $0x444] ss:$16 sps:$4 sm:$0xff]   ;;  %v3267_v27 = vld [vmem:[#allocation6 + $0x42c] ss:$16 sps:$4 sm:$0xff]  }
  0xc5   :  { %1388 = vmatpush1.bf16.msra.mxu0 %v3178_v28  ;;  %1550 = vmatpush1.bf16.msra.mxu1 %v3181_v29  ;;  %v3262_v28 = vld [vmem:[#allocation6 + $0x440] ss:$16 sps:$4 sm:$0xff]   ;;  %v3265_v29 = vld [vmem:[#allocation6 + $0x428] ss:$16 sps:$4 sm:$0xff]  }
  0xc6   :  { %1389 = vmatprep.subr.bf16.mxu0 %v3186_v30  ;;  %1551 = vmatprep.subr.bf16.mxu1 %v3189_v31  ;;  %v3270_v30 = vld [vmem:[#allocation6 + $0x464] ss:$16 sps:$4 sm:$0xff]   ;;  %v3273_v31 = vld [vmem:[#allocation6 + $0x44c] ss:$16 sps:$4 sm:$0xff]  }
  0xc9   :  { %1390 = vmatpush1.bf16.msra.mxu0 %v3184_v32  ;;  %1552 = vmatpush1.bf16.msra.mxu1 %v3187_v33  ;;  %v3268_v32 = vld [vmem:[#allocation6 + $0x460] ss:$16 sps:$4 sm:$0xff]   ;;  %v3271_v33 = vld [vmem:[#allocation6 + $0x448] ss:$16 sps:$4 sm:$0xff]  }
  0xca   :  { %1391 = vmatprep.subr.bf16.mxu0 %v3192_v34  ;;  %1553 = vmatprep.subr.bf16.mxu1 %v3195_v35  ;;  %v3276_v34 = vld [vmem:[#allocation6 + $0x484] ss:$16 sps:$4 sm:$0xff]   ;;  %v3279_v35 = vld [vmem:[#allocation6 + $0x46c] ss:$16 sps:$4 sm:$0xff]  }
  0xcd   :  { %1392 = vmatpush1.bf16.msra.mxu0 %v3190_v38  ;;  %1554 = vmatpush1.bf16.msra.mxu1 %v3193_v39  ;;  %v3282_v38 = vld [vmem:[#allocation6 + $0x4a4] ss:$16 sps:$4 sm:$0xff]   ;;  %v3285_v39 = vld [vmem:[#allocation6 + $0x48c] ss:$16 sps:$4 sm:$0xff]  }
  0xce   :  { %1393 = vmatprep.subr.bf16.mxu0 %v3198_v40  ;;  %1555 = vmatprep.subr.bf16.mxu1 %v3201_v41  ;;  %v3280_v40 = vld [vmem:[#allocation6 + $0x4a0] ss:$16 sps:$4 sm:$0xff]   ;;  %v3283_v41 = vld [vmem:[#allocation6 + $0x488] ss:$16 sps:$4 sm:$0xff]  }
  0xd1   :  { %1394 = vmatpush1.bf16.msra.mxu0 %v3196_v42  ;;  %1556 = vmatpush1.bf16.msra.mxu1 %v3199_v43  ;;  %v3288_v42 = vld [vmem:[#allocation6 + $0x4c4] ss:$16 sps:$4 sm:$0xff]   ;;  %v3291_v43 = vld [vmem:[#allocation6 + $0x4ac] ss:$16 sps:$4 sm:$0xff]  }
  0xd2   :  { %1395 = vmatprep.subr.bf16.mxu0 %v3204_v44  ;;  %1557 = vmatprep.subr.bf16.mxu1 %v3207_v45  ;;  %v3286_v44 = vld [vmem:[#allocation6 + $0x4c0] ss:$16 sps:$4 sm:$0xff]   ;;  %v3289_v45 = vld [vmem:[#allocation6 + $0x4a8] ss:$16 sps:$4 sm:$0xff]  }
  0xd5   :  { %1396 = vmatpush1.bf16.msra.mxu0 %v3202_v46  ;;  %1558 = vmatpush1.bf16.msra.mxu1 %v3205_v47  ;;  %v3294_v46 = vld [vmem:[#allocation6 + $0x4e4] ss:$16 sps:$4 sm:$0xff]   ;;  %v3297_v47 = vld [vmem:[#allocation6 + $0x4cc] ss:$16 sps:$4 sm:$0xff]  }
  0xd6   :  { %1397 = vmatprep.subr.bf16.mxu0 %v3210_v48  ;;  %1559 = vmatprep.subr.bf16.mxu1 %v3213_v49  ;;  %v3292_v48 = vld [vmem:[#allocation6 + $0x4e0] ss:$16 sps:$4 sm:$0xff]   ;;  %v3295_v49 = vld [vmem:[#allocation6 + $0x4c8] ss:$16 sps:$4 sm:$0xff]  }
  0xd9   :  { %1398 = vmatpush1.bf16.msra.mxu0 %v3208_v50  ;;  %1560 = vmatpush1.bf16.msra.mxu1 %v3211_v51  ;;  %v3300_v50 = vld [vmem:[#allocation6 + $0x504] ss:$16 sps:$4 sm:$0xff]   ;;  %v3303_v51 = vld [vmem:[#allocation6 + $0x4ec] ss:$16 sps:$4 sm:$0xff]  }
  0xda   :  { %1399 = vmatprep.subr.bf16.mxu0 %v3216_v52  ;;  %1561 = vmatprep.subr.bf16.mxu1 %v3219_v53  ;;  %v3298_v52 = vld [vmem:[#allocation6 + $0x500] ss:$16 sps:$4 sm:$0xff]   ;;  %v3301_v53 = vld [vmem:[#allocation6 + $0x4e8] ss:$16 sps:$4 sm:$0xff]  }
  0xdd   :  { %1400 = vmatpush1.bf16.msra.mxu0 %v3214_v54  ;;  %1562 = vmatpush1.bf16.msra.mxu1 %v3217_v55  ;;  %v3306_v54 = vld [vmem:[#allocation6 + $0x524] ss:$16 sps:$4 sm:$0xff]   ;;  %v3309_v55 = vld [vmem:[#allocation6 + $0x50c] ss:$16 sps:$4 sm:$0xff]  }
  0xde   :  { %1401 = vmatprep.subr.bf16.mxu0 %v3222_v56  ;;  %1563 = vmatprep.subr.bf16.mxu1 %v3225_v57  ;;  %v3304_v56 = vld [vmem:[#allocation6 + $0x520] ss:$16 sps:$4 sm:$0xff]   ;;  %v3307_v57 = vld [vmem:[#allocation6 + $0x508] ss:$16 sps:$4 sm:$0xff]  }
  0xe1   :  { %1402 = vmatpush1.bf16.msra.mxu0 %v3220_v58  ;;  %1564 = vmatpush1.bf16.msra.mxu1 %v3223_v59  ;;  %v3312_v58 = vld [vmem:[#allocation6 + $0x544] ss:$16 sps:$4 sm:$0xff]   ;;  %v3315_v59 = vld [vmem:[#allocation6 + $0x52c] ss:$16 sps:$4 sm:$0xff]  }
  0xe2   :  { %1403 = vmatprep.subr.bf16.mxu0 %v3228_v60  ;;  %1565 = vmatprep.subr.bf16.mxu1 %v3231_v61  ;;  %v3310_v60 = vld [vmem:[#allocation6 + $0x540] ss:$16 sps:$4 sm:$0xff]   ;;  %v3313_v61 = vld [vmem:[#allocation6 + $0x528] ss:$16 sps:$4 sm:$0xff]  }
  0xe5   :  { %1404 = vmatpush1.bf16.msra.mxu0 %v3226_v62  ;;  %1566 = vmatpush1.bf16.msra.mxu1 %v3229_v63  ;;  %v3318_v62 = vld [vmem:[#allocation6 + $0x564] ss:$16 sps:$4 sm:$0xff]   ;;  %v3321_v63 = vld [vmem:[#allocation6 + $0x54c] ss:$16 sps:$4 sm:$0xff]  }
  0xe6   :  { %1405 = vmatprep.subr.bf16.mxu0 %v3234_v0  ;;  %1567 = vmatprep.subr.bf16.mxu1 %v3237_v2  ;;  %v3316_v0 = vld [vmem:[#allocation6 + $0x560] ss:$16 sps:$4 sm:$0xff]   ;;  %v3319_v2 = vld [vmem:[#allocation6 + $0x548] ss:$16 sps:$4 sm:$0xff]  }
  0xe9   :  { %1406 = vmatpush1.bf16.msra.mxu0 %v3232_v3  ;;  %1568 = vmatpush1.bf16.msra.mxu1 %v3235_v4  ;;  %v3324_v3 = vld [vmem:[#allocation6 + $0x584] ss:$16 sps:$4 sm:$0xff]   ;;  %v3327_v4 = vld [vmem:[#allocation6 + $0x56c] ss:$16 sps:$4 sm:$0xff]  }
  0xea   :  { %1407 = vmatprep.subr.bf16.mxu0 %v3240_v5  ;;  %1569 = vmatprep.subr.bf16.mxu1 %v3243_v6  ;;  %v3322_v5 = vld [vmem:[#allocation6 + $0x580] ss:$16 sps:$4 sm:$0xff]   ;;  %v3325_v6 = vld [vmem:[#allocation6 + $0x568] ss:$16 sps:$4 sm:$0xff]  }
  0xed   :  { %1408 = vmatpush1.bf16.msra.mxu0 %v3238_v7  ;;  %1570 = vmatpush1.bf16.msra.mxu1 %v3241_v8  ;;  %v3330_v7 = vld [vmem:[#allocation6 + $0x5a4] ss:$16 sps:$4 sm:$0xff]   ;;  %v3333_v8 = vld [vmem:[#allocation6 + $0x58c] ss:$16 sps:$4 sm:$0xff]  }
  0xee   :  { %1409 = vmatprep.subr.bf16.mxu0 %v3246_v9  ;;  %1571 = vmatprep.subr.bf16.mxu1 %v3249_v10  ;;  %v3328_v9 = vld [vmem:[#allocation6 + $0x5a0] ss:$16 sps:$4 sm:$0xff]   ;;  %v3331_v10 = vld [vmem:[#allocation6 + $0x588] ss:$16 sps:$4 sm:$0xff]  }
  0xf1   :  { %1410 = vmatpush1.bf16.msra.mxu0 %v3244_v12  ;;  %1572 = vmatpush1.bf16.msra.mxu1 %v3247_v14  ;;  %v3336_v12 = vld [vmem:[#allocation6 + $0x5c4] ss:$16 sps:$4 sm:$0xff]   ;;  %v3334_v14 = vld [vmem:[#allocation6 + $0x5c0] ss:$16 sps:$4 sm:$0xff]  }
  0xf2   :  { %1420 = vmatprep.subr.bf16.mxu0 %v3252_v15  ;;  %1573 = vmatprep.subr.bf16.mxu1 %v3255_v16  ;;  %v3337_v15 = vld [vmem:[#allocation6 + $0x5a8] ss:$16 sps:$4 sm:$0xff]   ;;  %v3342_v16 = vld [vmem:[#allocation6 + $0x5e4] ss:$16 sps:$4 sm:$0xff]  }
  0xf4   :  { %1412 = vmatmul.mubr.bf16.vlgmr.msra.gmra.mrb[0].mxu0 %v131_v17 }
  0xf5   :  { %1421 = vmatpush1.bf16.msra.mxu0 %v3250_v18  ;;  %1452 = vmatprep.mubr.bf16.mxu0 %v134_v23  ;;  %v3340_v18 = vld [vmem:[#allocation6 + $0x5e0] ss:$16 sps:$4 sm:$0xff]  }
  0xf6   :  { %1574 = vmatpush1.bf16.msra.mxu1 %v3253_v19  ;;  %1422 = vmatprep.subr.bf16.mxu0 %v3258_v20  ;;  %v126_v19 = vld [vmem:[#allocation3 + $0x20] sm:$0xff] }
  0xf7   :  { %1584 = vmatprep.subr.bf16.mxu1 %v3261_v22  ;;  %v3343_v20 = vld [vmem:[#allocation6 + $0x5c8] ss:$16 sps:$4 sm:$0xff]   ;;  %v3348_v22 = vld [vmem:[#allocation6 + $0x5ec] ss:$16 sps:$4 sm:$0xff]  }
  0xf9   :  { %1423 = vmatpush1.bf16.msra.mxu0 %v3256_v24  ;;  %1576 = vmatmul.mubr.bf16.vlgmr.msra.gmra.mrb[4].mxu1 %v131_v17  ;;  %v3345_v17 = vld [vmem:[#allocation6 + $0x5cc] ss:$16 sps:$4 sm:$0xff]  }
  0xfa   :  { %1585 = vmatpush1.bf16.msra.mxu1 %v3259_v25  ;;  %1424 = vmatprep.subr.bf16.mxu0 %v3264_v26  ;;  %v3352_v24 = vld [vmem:[#allocation9] ss:$8 sps:$4 sm:$0xff]   ;;  %v3346_v25 = vld [vmem:[#allocation6 + $0x5e8] ss:$16 sps:$4 sm:$0xff]  }
  0xfb   :  { %1586 = vmatprep.subr.bf16.mxu1 %v3267_v27  ;;  %1616 = vmatprep.mubr.bf16.mxu1 %v134_v23  ;;  %v133_v23 = vpack.c.bf16 %v126_v19, %v126_v19  ;;  %v3357_v26 = vld [vmem:[#allocation9 + $0x14] ss:$8 sps:$4 sm:$0xff]   ;;  %v3351_v27 = vld [vmem:[#allocation6 + $0x60c] ss:$16 sps:$4 sm:$0xff]  }
  0xfd   :  { %1425 = vmatpush1.bf16.msra.mxu0 %v3262_v28  ;;  %v3355_v28 = vld [vmem:[#allocation9 + $0x10] ss:$8 sps:$4 sm:$0xff]  }
  0xfe   :  { %1587 = vmatpush1.bf16.msra.mxu1 %v3265_v29  ;;  %1426 = vmatprep.subr.bf16.mxu0 %v3270_v30  ;;  %v3349_v29 = vld [vmem:[#allocation6 + $0x608] ss:$16 sps:$4 sm:$0xff]  }
  0xff   :  { %1588 = vmatprep.subr.bf16.mxu1 %v3273_v31  ;;  %v3360_v30 = vld [vmem:[#allocation9 + $0x24] ss:$8 sps:$4 sm:$0xff]   ;;  %v3358_v31 = vld [vmem:[#allocation9 + $0x20] ss:$8 sps:$4 sm:$0xff]  }
 0x101   :  { %1427 = vmatpush1.bf16.msra.mxu0 %v3268_v32  ;;  %v3363_v32 = vld [vmem:[#allocation9 + $0x34] ss:$8 sps:$4 sm:$0xff]  }
 0x102   :  { %1589 = vmatpush1.bf16.msra.mxu1 %v3271_v33  ;;  %1428 = vmatprep.subr.bf16.mxu0 %v3276_v34  ;;  %v3361_v33 = vld [vmem:[#allocation9 + $0x30] ss:$8 sps:$4 sm:$0xff]   ;;  %v3366_v34 = vld [vmem:[#allocation9 + $0x44] ss:$8 sps:$4 sm:$0xff]  }
 0x103   :  { %1590 = vmatprep.subr.bf16.mxu1 %v3279_v35  ;;  %v3364_v35 = vld [vmem:[#allocation9 + $0x40] ss:$8 sps:$4 sm:$0xff]  }
 0x105   :  { %1429 = vmatpush1.bf16.msra.mxu0 %v3274_v36  ;;  %v3369_v36 = vld [vmem:[#allocation9 + $0x54] ss:$8 sps:$4 sm:$0xff]  }
 0x106   :  { %1591 = vmatpush1.bf16.msra.mxu1 %v3277_v37  ;;  %1430 = vmatprep.subr.bf16.mxu0 %v3282_v38  ;;  %v3367_v37 = vld [vmem:[#allocation9 + $0x50] ss:$8 sps:$4 sm:$0xff]   ;;  %v3372_v38 = vld [vmem:[#allocation9 + $0x64] ss:$8 sps:$4 sm:$0xff]  }
 0x107   :  { %1592 = vmatprep.subr.bf16.mxu1 %v3285_v39  ;;  %v3370_v39 = vld [vmem:[#allocation9 + $0x60] ss:$8 sps:$4 sm:$0xff]  }
 0x109   :  { %1431 = vmatpush1.bf16.msra.mxu0 %v3280_v40 }
 0x10a   :  { %1593 = vmatpush1.bf16.msra.mxu1 %v3283_v41  ;;  %1432 = vmatprep.subr.bf16.mxu0 %v3288_v42  ;;  %v3373_v42 = vld [vmem:[#allocation9 + $0x70] ss:$8 sps:$4 sm:$0xff]  }
 0x10b   :  { %1594 = vmatprep.subr.bf16.mxu1 %v3291_v43 }
 0x10d   :  { %1433 = vmatpush1.bf16.msra.mxu0 %v3286_v44  ;;  %v3378_v44 = vld [vmem:[#allocation9 + $0x84] ss:$8 sps:$4 sm:$0xff]  }
 0x10e   :  { %1595 = vmatpush1.bf16.msra.mxu1 %v3289_v45  ;;  %1434 = vmatprep.subr.bf16.mxu0 %v3294_v46  ;;  %v3381_v46 = vld [vmem:[#allocation9 + $0x94] ss:$8 sps:$4 sm:$0xff]  }
 0x10f   :  { %1596 = vmatprep.subr.bf16.mxu1 %v3297_v47  ;;  %v3379_v47 = vld [vmem:[#allocation9 + $0x90] ss:$8 sps:$4 sm:$0xff]  }
 0x111   :  { %1435 = vmatpush1.bf16.msra.mxu0 %v3292_v48  ;;  %v3384_v48 = vld [vmem:[#allocation9 + $0xa4] ss:$8 sps:$4 sm:$0xff]  }
 0x112   :  { %1597 = vmatpush1.bf16.msra.mxu1 %v3295_v49  ;;  %1436 = vmatprep.subr.bf16.mxu0 %v3300_v50  ;;  %v3382_v49 = vld [vmem:[#allocation9 + $0xa0] ss:$8 sps:$4 sm:$0xff]   ;;  %v3387_v50 = vld [vmem:[#allocation9 + $0xb4] ss:$8 sps:$4 sm:$0xff]  }
 0x113   :  { %1598 = vmatprep.subr.bf16.mxu1 %v3303_v51  ;;  %v3385_v51 = vld [vmem:[#allocation9 + $0xb0] ss:$8 sps:$4 sm:$0xff]  }
 0x115   :  { %1437 = vmatpush1.bf16.msra.mxu0 %v3298_v52  ;;  %v3390_v52 = vld [vmem:[#allocation9 + $0xc4] ss:$8 sps:$4 sm:$0xff]  }
 0x116   :  { %1599 = vmatpush1.bf16.msra.mxu1 %v3301_v53  ;;  %1438 = vmatprep.subr.bf16.mxu0 %v3306_v54  ;;  %v3388_v53 = vld [vmem:[#allocation9 + $0xc0] ss:$8 sps:$4 sm:$0xff]   ;;  %v3393_v54 = vld [vmem:[#allocation9 + $0xd4] ss:$8 sps:$4 sm:$0xff]  }
 0x117   :  { %1600 = vmatprep.subr.bf16.mxu1 %v3309_v55  ;;  %v3391_v55 = vld [vmem:[#allocation9 + $0xd0] ss:$8 sps:$4 sm:$0xff]  }
 0x119   :  { %1439 = vmatpush1.bf16.msra.mxu0 %v3304_v56  ;;  %v3396_v56 = vld [vmem:[#allocation9 + $0xe4] ss:$8 sps:$4 sm:$0xff]  }
 0x11a   :  { %1601 = vmatpush1.bf16.msra.mxu1 %v3307_v57  ;;  %1440 = vmatprep.subr.bf16.mxu0 %v3312_v58  ;;  %v3394_v57 = vld [vmem:[#allocation9 + $0xe0] ss:$8 sps:$4 sm:$0xff]   ;;  %v3399_v58 = vld [vmem:[#allocation9 + $0xf4] ss:$8 sps:$4 sm:$0xff]  }
 0x11b   :  { %1602 = vmatprep.subr.bf16.mxu1 %v3315_v59  ;;  %v3397_v59 = vld [vmem:[#allocation9 + $0xf0] ss:$8 sps:$4 sm:$0xff]  }
 0x11d   :  { %1441 = vmatpush1.bf16.msra.mxu0 %v3310_v60  ;;  %v3402_v60 = vld [vmem:[#allocation9 + $0x104] ss:$8 sps:$4 sm:$0xff]  }
 0x11e   :  { %1603 = vmatpush1.bf16.msra.mxu1 %v3313_v61  ;;  %1442 = vmatprep.subr.bf16.mxu0 %v3318_v62  ;;  %v3448_v61 = vld [vmem:[%s3964_s5 + $0x40] sm:$0xff]  }
 0x11f   :  { %1604 = vmatprep.subr.bf16.mxu1 %v3321_v63  ;;  %v3449_v62 = vld [vmem:[%s3964_s5] sm:$0xff]   ;;  %v3450_v63 = vld [vmem:[%s3964_s5 + $0x48] sm:$0xff]  }
 0x121   :  { %1443 = vmatpush1.bf16.msra.mxu0 %v3316_v0  ;;  %v3451_v0 = vld [vmem:[%s3964_s5 + $0x8] sm:$0xff]  }
 0x122   :  { %1605 = vmatpush1.bf16.msra.mxu1 %v3319_v2  ;;  %1444 = vmatprep.subr.bf16.mxu0 %v3324_v3  ;;  %v3452_v2 = vld [vmem:[%s3964_s5 + $0x50] sm:$0xff]  }
 0x123   :  { %1606 = vmatprep.subr.bf16.mxu1 %v3327_v4  ;;  %v3453_v3 = vld [vmem:[%s3964_s5 + $0x10] sm:$0xff]   ;;  %v3454_v4 = vld [vmem:[%s3964_s5 + $0x58] sm:$0xff]  }
 0x125   :  { %1445 = vmatpush1.bf16.msra.mxu0 %v3322_v5  ;;  %v3455_v5 = vld [vmem:[%s3964_s5 + $0x18] sm:$0xff]  }
 0x126   :  { %1607 = vmatpush1.bf16.msra.mxu1 %v3325_v6  ;;  %1446 = vmatprep.subr.bf16.mxu0 %v3330_v7  ;;  %v3456_v6 = vld [vmem:[%s3964_s5 + $0x60] sm:$0xff]  }
 0x127   :  { %1608 = vmatprep.subr.bf16.mxu1 %v3333_v8  ;;  %v3457_v7 = vld [vmem:[%s3964_s5 + $0x20] sm:$0xff]   ;;  %v3458_v8 = vld [vmem:[%s3964_s5 + $0x68] sm:$0xff]  }
 0x129   :  { %1447 = vmatpush1.bf16.msra.mxu0 %v3328_v9  ;;  %v3459_v9 = vld [vmem:[%s3964_s5 + $0x28] sm:$0xff]  }
 0x12a   :  { %1609 = vmatpush1.bf16.msra.mxu1 %v3331_v10  ;;  %1448 = vmatprep.subr.bf16.mxu0 %v3336_v12  ;;  %v334_v10 = vlaneseq }
 0x12b   :  { %1610 = vmatprep.subr.bf16.mxu1 %v3339_v13 }
 0x12c   :  { %v3848_v12 = vshrl.u32 %v334_v10, 7  ;;  %v3460_v10 = vld [vmem:[%s3964_s5 + $0x70] sm:$0xff]  }
 0x12d   :  { %1449 = vmatpush1.bf16.msra.mxu0 %v3334_v14  ;;  %v3853_v14 = vld [vmem:[#allocation8] sm:$0xf] }
 0x12e   :  { %1611 = vmatpush1.bf16.msra.mxu1 %v3337_v15  ;;  %1450 = vmatprep.subr.bf16.mxu0 %v3342_v16  ;;  %v3851_v13 = vsub.s32 0, %v3848_v12  ;;  %v340_v15 = vsub.s32 1, %v3848_v12 }
 0x12f   :  { %1612 = vmatprep.subr.bf16.mxu1 %v3345_v17 }
 0x130   :  { %v337_v16 = vrot.slane %v3853_v14, %v3851_v13  ;;  %v341_v17 = vrot.slane %v3853_v14, %v340_v15 }
 0x131   :  { %1451 = vmatpush1.bf16.msra.mxu0 %v3340_v18 }
 0x132   :  { %1613 = vmatpush1.bf16.msra.mxu1 %v3343_v20  ;;  %2070 = vmatprep.subr.bf16.mxu0 %v3354_v21 }
 0x133   :  { %1614 = vmatprep.subr.bf16.mxu1 %v3348_v22 }
 0x134   :  { %1453 = vmatmul.mubr.bf16.vlgmr.msra.gmra.mrb[0].mxu0 %v133_v23 }
 0x135   :  { %2071 = vmatpush1.bf16.msra.mxu0 %v3352_v24 }
 0x136   :  { %1615 = vmatpush1.bf16.msra.mxu1 %v3346_v25  ;;  %2072 = vmatprep.subr.bf16.mxu0 %v3357_v26 }
 0x137   :  { %1625 = vmatprep.subr.bf16.mxu1 %v3351_v27 }
 0x139   :  { %1617 = vmatmul.mubr.bf16.vlgmr.msra.gmra.mrb[4].mxu1 %v133_v23  ;;  %2073 = vmatpush1.bf16.msra.mxu0 %v3355_v28 }
 0x13a   :  { %1626 = vmatpush1.bf16.msra.mxu1 %v3349_v29  ;;  %1657 = vmatprep.mubr.bf16.mxu1 %v3650_v1  ;;  %v3375_v1 = vld [vmem:[#allocation9 + $0x74] ss:$8 sps:$4 sm:$0xff]   ;;  %v3400_v29 = vld [vmem:[#allocation9 + $0x100] ss:$8 sps:$4 sm:$0xff]  }
 0x13b   :  { %2074 = vmatprep.subr.bf16.mxu0 %v3360_v30  ;;  %2936 = vmatprep.subr.bf16.mxu1 %v3448_v61  ;;  %v3436_v61 = vld [vmem:[#allocation9 + $0x1c0] ss:$8 sps:$4 sm:$0xff]  }
 0x13d   :  { %2075 = vmatpush1.bf16.msra.mxu0 %v3358_v31  ;;  %v3405_v31 = vld [vmem:[#allocation9 + $0x114] ss:$8 sps:$4 sm:$0xff]  }
 0x13e   :  { %2076 = vmatprep.subr.bf16.mxu0 %v3363_v32  ;;  %v348_v32 = vsub.s32 3, %v3848_v12 }
 0x141   :  { %2077 = vmatpush1.bf16.msra.mxu0 %v3361_v33  ;;  %v3403_v33 = vld [vmem:[#allocation9 + $0x110] ss:$8 sps:$4 sm:$0xff]  }
 0x142   :  { %2078 = vmatprep.subr.bf16.mxu0 %v3366_v34  ;;  %v3408_v34 = vld [vmem:[#allocation9 + $0x124] ss:$8 sps:$4 sm:$0xff]  }
 0x145   :  { %2837 = vmatmul.mubr.msk.bf16.vlgmr.msra.gmra.mrb[4].mxu1 %vm1334_vm0, %v3801_v11  ;;  %2079 = vmatpush1.bf16.msra.mxu0 %v3364_v35  ;;  %v3376_v11 = vld [vmem:[#allocation9 + $0x80] ss:$8 sps:$4 sm:$0xff]   ;;  %v349_v35 = vrot.slane %v3853_v14, %v348_v32 }
 0x146   :  { %2080 = vmatprep.subr.bf16.mxu0 %v3369_v36  ;;  %2937 = vmatpush3.bf16.msra.mxu1 %v3449_v62  ;;  %v3406_v36 = vld [vmem:[#allocation9 + $0x120] ss:$8 sps:$4 sm:$0xff]   ;;  %v344_v62 = vsub.s32 2, %v3848_v12 }
 0x147   :  { %2938 = vmatprep.subr.bf16.mxu1 %v3450_v63  ;;  %v3441_v63 = vld [vmem:[#allocation9 + $0x1d4] ss:$8 sps:$4 sm:$0xff]   ;;  %v3465_v12 = vld [vmem:[%s3966_s7 + $0x8] sm:$0xff]  }
 0x149   :  { %2081 = vmatpush1.bf16.msra.mxu0 %v3367_v37 }
 0x14a   :  { %2082 = vmatprep.subr.bf16.mxu0 %v3372_v38  ;;  %2939 = vmatpush3.bf16.msra.mxu1 %v3451_v0  ;;  %v3411_v38 = vld [vmem:[#allocation9 + $0x134] ss:$8 sps:$4 sm:$0xff]   ;;  %v3439_v0 = vld [vmem:[#allocation9 + $0x1d0] ss:$8 sps:$4 sm:$0xff]  }
 0x14b   :  { %v3808_v40 = vpop.f32.mrb[0].mxu1  ;;  %2940 = vmatprep.subr.bf16.mxu1 %v3452_v2  ;;  %v345_v2 = vrot.slane %v3853_v14, %v344_v62  ;;  %v3461_v14 = vld [vmem:[%s3964_s5 + $0x30] sm:$0xff]  }
 0x14c   :  { %v3810_v41 = vpop.f32.mrb[1].mxu1 }
 0x14d   :  { %2083 = vmatpush1.bf16.msra.mxu0 %v3370_v39  ;;  %v1499_v43 = vpop.f32.mrb[2].mxu1 }
 0x14e   :  { %2084 = vmatprep.subr.bf16.mxu0 %v3375_v1  ;;  %v1500_v45 = vpop.f32.mrb[3].mxu1  ;;  %2941 = vmatpush3.bf16.msra.mxu1 %v3453_v3  ;;  %v3444_v3 = vld [vmem:[#allocation9 + $0x1e4] ss:$8 sps:$4 sm:$0xff]  }
 0x14f   :  { %2942 = vmatprep.subr.bf16.mxu1 %v3454_v4  ;;  %v3442_v4 = vld [vmem:[#allocation9 + $0x1e0] ss:$8 sps:$4 sm:$0xff]  }
 0x151   :  { %2085 = vmatpush1.bf16.msra.mxu0 %v3373_v42  ;;  %v3409_v42 = vld [vmem:[#allocation9 + $0x130] ss:$8 sps:$4 sm:$0xff]  }
 0x152   :  { %2086 = vmatprep.subr.bf16.mxu0 %v3378_v44  ;;  %2943 = vmatpush3.bf16.msra.mxu1 %v3455_v5  ;;  %v3414_v44 = vld [vmem:[#allocation9 + $0x144] ss:$8 sps:$4 sm:$0xff]  }
 0x153   :  { %2944 = vmatprep.subr.bf16.mxu1 %v3456_v6  ;;  %v3447_v6 = vld [vmem:[#allocation9 + $0x1f4] ss:$8 sps:$4 sm:$0xff]  }
 0x155   :  { %2087 = vmatpush1.bf16.msra.mxu0 %v3376_v11  ;;  %v3412_v11 = vld [vmem:[#allocation9 + $0x140] ss:$8 sps:$4 sm:$0xff]  }
 0x156   :  { %2088 = vmatprep.subr.bf16.mxu0 %v3381_v46  ;;  %2945 = vmatpush3.bf16.msra.mxu1 %v3457_v7  ;;  %v3417_v46 = vld [vmem:[#allocation9 + $0x154] ss:$8 sps:$4 sm:$0xff]   ;;  %v3445_v7 = vld [vmem:[#allocation9 + $0x1f0] ss:$8 sps:$4 sm:$0xff]  }
 0x157   :  { %2946 = vmatprep.subr.bf16.mxu1 %v3458_v8 }
 0x159   :  { %2089 = vmatpush1.bf16.msra.mxu0 %v3379_v47  ;;  %v3415_v47 = vld [vmem:[#allocation9 + $0x150] ss:$8 sps:$4 sm:$0xff]  }
 0x15a   :  { %2090 = vmatprep.subr.bf16.mxu0 %v3384_v48  ;;  %2947 = vmatpush3.bf16.msra.mxu1 %v3459_v9  ;;  %v3420_v48 = vld [vmem:[#allocation9 + $0x164] ss:$8 sps:$4 sm:$0xff]  }
 0x15b   :  { %2948 = vmatprep.subr.bf16.mxu1 %v3460_v10 }
 0x15d   :  { %2091 = vmatpush1.bf16.msra.mxu0 %v3382_v49  ;;  %v3418_v49 = vld [vmem:[#allocation9 + $0x160] ss:$8 sps:$4 sm:$0xff]  }
 0x15e   :  { %2092 = vmatprep.subr.bf16.mxu0 %v3387_v50  ;;  %v3423_v50 = vld [vmem:[#allocation9 + $0x174] ss:$8 sps:$4 sm:$0xff]   ;;  %2949 = vmatpush3.bf16.msra.mxu1 %v3461_v14 }
 0x161   :  { %2093 = vmatpush1.bf16.msra.mxu0 %v3385_v51  ;;  %v3421_v51 = vld [vmem:[#allocation9 + $0x170] ss:$8 sps:$4 sm:$0xff]  }
 0x162   :  { %2094 = vmatprep.subr.bf16.mxu0 %v3390_v52  ;;  %v3426_v52 = vld [vmem:[#allocation9 + $0x184] ss:$8 sps:$4 sm:$0xff]  }
 0x165   :  { %2095 = vmatpush1.bf16.msra.mxu0 %v3388_v53  ;;  %v3424_v53 = vld [vmem:[#allocation9 + $0x180] ss:$8 sps:$4 sm:$0xff]  }
 0x166   :  { %2096 = vmatprep.subr.bf16.mxu0 %v3393_v54  ;;  %v3429_v54 = vld [vmem:[#allocation9 + $0x194] ss:$8 sps:$4 sm:$0xff]  }
 0x169   :  { %2097 = vmatpush1.bf16.msra.mxu0 %v3391_v55  ;;  %v3427_v55 = vld [vmem:[#allocation9 + $0x190] ss:$8 sps:$4 sm:$0xff]  }
 0x16a   :  { %2098 = vmatprep.subr.bf16.mxu0 %v3396_v56  ;;  %v3432_v56 = vld [vmem:[#allocation9 + $0x1a4] ss:$8 sps:$4 sm:$0xff]  }
 0x16d   :  { %2099 = vmatpush1.bf16.msra.mxu0 %v3394_v57  ;;  %v3430_v57 = vld [vmem:[#allocation9 + $0x1a0] ss:$8 sps:$4 sm:$0xff]  }
 0x16e   :  { %2100 = vmatprep.subr.bf16.mxu0 %v3399_v58  ;;  %v3435_v58 = vld [vmem:[#allocation9 + $0x1b4] ss:$8 sps:$4 sm:$0xff]  }
 0x171   :  { %2101 = vmatpush1.bf16.msra.mxu0 %v3397_v59  ;;  %v3433_v59 = vld [vmem:[#allocation9 + $0x1b0] ss:$8 sps:$4 sm:$0xff]  }
 0x172   :  { %2111 = vmatprep.subr.bf16.mxu0 %v3402_v60  ;;  %v3438_v60 = vld [vmem:[#allocation9 + $0x1c4] ss:$8 sps:$4 sm:$0xff]  }
 0x207   :  { %v1454_v18 = vpop.f32.mrb[0].mxu0 }
 0x208   :  { %v3011_v19 = vadd.f32 %v1454_v18, %v337_v16  ;;  %v1456_v20 = vpop.f32.mrb[1].mxu0  ;;  %v3462_v16 = vld [vmem:[%s3964_s5 + $0x78] sm:$0xff]   ;;  %v3651_v18 = vmov 0.0  }
 0x209   :  { %v3013_v21 = vadd.f32 %v1456_v20, %v341_v17  ;;  %v1458_v22 = vpop.f32.mrb[2].mxu0  ;;  %v3463_v17 = vld [vmem:[%s3964_s5 + $0x38] sm:$0xff]   ;;  %2950 = vmatprep.subr.bf16.mxu1 %v3462_v16  ;;  %s3653_s5 = smov [#allocation14]  }
 0x20a   :  { %v3012_v23 = vadd.f32 %v3011_v19, %v3808_v40  ;;  %v1459_v24 = vpop.f32.mrb[3].mxu0  ;;  %2951 = vmatpush3.bf16.msra.mxu1 %v3463_v17  ;;  %v1738_v19 = vld [vmem:[%s3963_s4] sm:$0x3] }
 0x20b   :  { %v3014_v25 = vadd.f32 %v3013_v21, %v3810_v41  ;;  %2974 = vmatprep.subr.bf16.mxu1 %v3651_v18  ;;  %v1743_v20 = vrot.slane %v1738_v19, %v3851_v13  ;;  %v1747_v21 = vrot.slane %v1738_v19, %v340_v15  ;;  %v3466_v15 = vld [vmem:[%s3966_s7 + $0x10] sm:$0xff]  }
 0x20c   :  { %v1666_v26 = vmax.f32 %v3012_v23, 0.0 }
 0x20d   :  { %v1667_v27 = vmax.f32 %v3014_v25, 0.0 }
 0x20e   :  { %v1670_v30 = vpack.c.bf16 %v1666_v26, %v1666_v26 }
 0x20f   :  { %v1671_v28 = vpack.c.bf16 %v1667_v27, %v1667_v27 }
 0x211   :  { %2102 = vmatprep.mubr.bf16.mxu0 %v1671_v28 }
 0x212   :  { %2103 = vmatmul.mubr.bf16.vlgmr.msra.gmra.mrb[4].mxu0 %v1670_v30 }
 0x213   :  { %2112 = vmatpush1.bf16.msra.mxu0 %v3400_v29 }
 0x214   :  { %2113 = vmatprep.subr.bf16.mxu0 %v3405_v31  ;;  %v3464_v31 = vld [vmem:[%s3966_s7] sm:$0xff]  }
 0x217   :  { %2114 = vmatpush1.bf16.msra.mxu0 %v3403_v33  ;;  %v3467_v33 = vld [vmem:[%s3966_s7 + $0x18] sm:$0xff]  }
 0x218   :  { %v1659_v37 = vpop.f32.mrb[4].mxu1  ;;  %2115 = vmatprep.subr.bf16.mxu0 %v3408_v34  ;;  %v3468_v34 = vld [vmem:[%s3966_s7 + $0x20] sm:$0xff]  }
 0x219   :  { %v1661_v39 = vpop.f32.mrb[5].mxu1  ;;  %v3015_v5 = vadd.f32 %v1659_v37, %v345_v2  ;;  %v3471_v37 = vld [vmem:[%s3966_s7 + $0x38] sm:$0xff]  }
 0x21a   :  { %v3016_v1 = vadd.f32 %v1661_v39, %v349_v35  ;;  %v1663_v40 = vpop.f32.mrb[6].mxu1  ;;  %v3469_v35 = vld [vmem:[%s3966_s7 + $0x28] sm:$0xff]   ;;  %v2902_v39 = vld [vmem:[#allocation11] ss:$0 sm:$0xff] }
 0x21b   :  { %v1664_v41 = vpop.f32.mrb[7].mxu1  ;;  %2116 = vmatpush1.bf16.msra.mxu0 %v3406_v36  ;;  %v1668_v8 = vmax.f32 %v3015_v5, 0.0  ;;  %v3470_v36 = vld [vmem:[%s3966_s7 + $0x30] sm:$0xff]  }
 0x21c   :  { %v1669_v43 = vmax.f32 %v3016_v1, 0.0  ;;  %2117 = vmatprep.subr.bf16.mxu0 %v3411_v38 }
 0x21d   :  { %v1672_v9 = vpack.c.bf16 %v1668_v8, %v1668_v8 }
 0x21e   :  { %v1673_v45 = vpack.c.bf16 %v1669_v43, %v1669_v43 }
 0x21f   :  { %2118 = vmatpush1.bf16.msra.mxu0 %v3409_v42 }
 0x220   :  { %2143 = vmatprep.mubr.bf16.mxu0 %v1673_v45  ;;  %2119 = vmatprep.subr.bf16.mxu0 %v3414_v44  ;;  %v3472_v45 = vld [vmem:[%s3968_s9] sm:$0xff]  }
 0x223   :  { %2120 = vmatpush1.bf16.msra.mxu0 %v3412_v11 }
 0x224   :  { %2121 = vmatprep.subr.bf16.mxu0 %v3417_v46  ;;  %v3473_v46 = vld [vmem:[%s3968_s9 + $0x8] sm:$0xff]  }
 0x227   :  { %2122 = vmatpush1.bf16.msra.mxu0 %v3415_v47  ;;  %v3474_v47 = vld [vmem:[%s3968_s9 + $0x10] sm:$0xff]  }
 0x228   :  { %2123 = vmatprep.subr.bf16.mxu0 %v3420_v48  ;;  %v3475_v48 = vld [vmem:[%s3968_s9 + $0x18] sm:$0xff]  }
 0x22b   :  { %2124 = vmatpush1.bf16.msra.mxu0 %v3418_v49  ;;  %v2919_v49 = vld [vmem:[#allocation12] ss:$0 sm:$0xff] }
 0x22c   :  { %2125 = vmatprep.subr.bf16.mxu0 %v3423_v50 }
 0x22f   :  { %2126 = vmatpush1.bf16.msra.mxu0 %v3421_v51 }
 0x230   :  { %2127 = vmatprep.subr.bf16.mxu0 %v3426_v52 }
 0x233   :  { %2128 = vmatpush1.bf16.msra.mxu0 %v3424_v53 }
 0x234   :  { %2129 = vmatprep.subr.bf16.mxu0 %v3429_v54 }
 0x237   :  { %2130 = vmatpush1.bf16.msra.mxu0 %v3427_v55 }
 0x238   :  { %2131 = vmatprep.subr.bf16.mxu0 %v3432_v56 }
 0x23b   :  { %2132 = vmatpush1.bf16.msra.mxu0 %v3430_v57  ;;  %v2533_v57 = vld [vmem:[#allocation2] sm:$0x1] }
 0x23c   :  { %2133 = vmatprep.subr.bf16.mxu0 %v3435_v58  ;;  %2536 = vperm.xlu0 %3057, %v2533_v57   ;;  %v2928_v58 = vld [vmem:[%s3969_s10] ss:$0 sm:$0xff]  ;;  %s2628_s10 = sshll.u32 %s3653_s5, 4  ;;  %s2629_s10 = int_to_ptr.vmem [resolvable:$true] %s2628_s10 }
 0x23d   :  { %s3608_s21 = scalar_lea.vmem %s2629_s10, 16  ;;  %s3612_s4 = scalar_lea.vmem %s2629_s10, 32 }
 0x23e   :  { %p3609_p6 = scmp.ne.s32.totalorder %s2629_s10, %s3608_s21  ;;  %p3613_p7 = scmp.lt.s32.totalorder %s2629_s10, %s2629_s10 }
 0x23f   :  { %2134 = vmatpush1.bf16.msra.mxu0 %v3433_v59  ;;  %p3614_p8 = scmp.lt.s32.totalorder %s3612_s4, %s3608_s21 }
 0x240   :  { %2135 = vmatprep.subr.bf16.mxu0 %v3438_v60 }
 0x241   :  { %p3615_p9 = por %p3614_p8, %p3613_p7 }
 0x243   :  { %2136 = vmatpush1.bf16.msra.mxu0 %v3436_v61  ;;  %p3616_p10 = pnand %p3615_p9, %p3609_p6 }
 0x244   :  { %2137 = vmatprep.subr.bf16.mxu0 %v3441_v63 }
 0x247   :  { %2138 = vmatpush1.bf16.msra.mxu0 %v3439_v0 }
 0x248   :  { %2139 = vmatprep.subr.bf16.mxu0 %v3444_v3 }
 0x24b   :  { %2140 = vmatpush1.bf16.msra.mxu0 %v3442_v4  ;;  %v2531_v4 = vld [vmem:[%s3970_s11] sm:$0x1] }
 0x24c   :  { %2141 = vmatprep.subr.bf16.mxu0 %v3447_v6 }
 0x24f   :  { %2142 = vmatpush1.bf16.msra.mxu0 %v3445_v7 }
 0x252   :  { %2144 = vmatmul.mubr.bf16.vlgmr.msra.gmra.mrb[4].mxu0 %v1672_v9 }
 0x2bb   :  { %v2537_v5 = vpop.permute.xlu0 %2536 }
 0x2bc   :  { %v2542_v6 = vrot.slane %v2537_v5, %v3851_v13 }
 0x325   :  { %v2145_v22 = vpop.f32.mrb[4].mxu0 }
 0x326   :  { %v3017_v23 = vadd.f32 %v2145_v22, %v1743_v20  ;;  %v2147_v24 = vpop.f32.mrb[5].mxu0 }
 0x327   :  { %v3018_v25 = vadd.f32 %v2147_v24, %v1747_v21  ;;  %v2149_v26 = vpop.f32.mrb[6].mxu0 }
 0x328   :  { %v2152_v27 = vmax.f32 %v3017_v23, 0.0  ;;  %v2150_v28 = vpop.f32.mrb[7].mxu0 }
 0x329   :  { %v2153_v29 = vmax.f32 %v3018_v25, 0.0 }
 0x32a   :  { %v2154_v32 = vpack.c.bf16 %v2152_v27, %v2152_v27 }
 0x32b   :  { %v2155_v30 = vpack.c.bf16 %v2153_v29, %v2153_v29 }
 0x32d   :  { %2323 = vmatprep.mubr.bf16.mxu1 %v2155_v30 }
 0x32e   :  { %2324 = vmatmul.mubr.bf16.vlgmr.msra.gmra.mrb[8].mxu1 %v2154_v32 }
 0x32f   :  { %2975 = vmatpush3.bf16.msra.mxu1 %v3464_v31  ;;  %2990 = vmatprep.mubr.msk.bf16.mxu1 %vm3652_vm1, %v3651_v18 }
 0x330   :  { %2976 = vmatprep.subr.bf16.mxu1 %v3651_v18 }
 0x333   :  { %2977 = vmatpush3.bf16.msra.mxu1 %v3465_v12 }
 0x334   :  { %2978 = vmatprep.subr.bf16.mxu1 %v3651_v18 }
 0x337   :  { %2979 = vmatpush3.bf16.msra.mxu1 %v3466_v15 }
 0x338   :  { %2980 = vmatprep.subr.bf16.mxu1 %v3651_v18 }
 0x33b   :  { %2981 = vmatpush3.bf16.msra.mxu1 %v3467_v33 }
 0x33c   :  { %2982 = vmatprep.subr.bf16.mxu1 %v3651_v18 }
 0x33f   :  { %2983 = vmatpush3.bf16.msra.mxu1 %v3468_v34 }
 0x340   :  { %2984 = vmatprep.subr.bf16.mxu1 %v3651_v18 }
 0x343   :  { %2985 = vmatpush3.bf16.msra.mxu1 %v3469_v35 }
 0x344   :  { %2986 = vmatprep.subr.bf16.mxu1 %v3651_v18 }
 0x347   :  { %2987 = vmatpush3.bf16.msra.mxu1 %v3470_v36 }
 0x348   :  { %2988 = vmatprep.subr.bf16.mxu1 %v3651_v18 }
 0x34b   :  { %2989 = vmatpush3.bf16.msra.mxu1 %v3471_v37 }
 0x34c   :  { %2994 = vmatprep.subr.bf16.mxu1 %v3651_v18 }
 0x401   :  { %v2952_v38 = vpop.f32.mrb[8].mxu1 }
 0x402   :  { %v2953_v1 = vpop.f32.mrb[9].mxu1 }
 0x403   :  { %v2954_v40 = vadd.f32 %v2953_v1, %v2952_v38  ;;  %v2955_v41 = vpop.f32.mrb[10].mxu1 }
 0x404   :  { %v2956_v42 = vpop.f32.mrb[11].mxu1 }
 0x405   :  { %v2326_v43 = vadd.f32 %v2954_v40, %v2902_v39 }
 0x407   :  { %v2331_v44 = vmax.f32 %v2326_v43, 0.0 }
 0x409   :  { %v2332_v11 = vpack.c.bf16 %v2331_v44, %v2331_v44 }
 0x40b   :  { %2991 = vmatmul.mubr.bf16.vlgmr.msra.gmra.mrb[12].mxu1 %v2332_v11 }
 0x40c   :  { %2995 = vmatpush3.bf16.msra.mxu1 %v3472_v45  ;;  %3002 = vmatprep.mubr.msk.bf16.mxu1 %vm3652_vm1, %v3651_v18 }
 0x40d   :  { %2996 = vmatprep.subr.bf16.mxu1 %v3651_v18 }
 0x410   :  { %2997 = vmatpush3.bf16.msra.mxu1 %v3473_v46 }
 0x411   :  { %2998 = vmatprep.subr.bf16.mxu1 %v3651_v18 }
 0x414   :  { %2999 = vmatpush3.bf16.msra.mxu1 %v3474_v47 }
 0x415   :  { %3000 = vmatprep.subr.bf16.mxu1 %v3651_v18 }
 0x418   :  { %3001 = vmatpush3.bf16.msra.mxu1 %v3475_v48 }
 0x419   :  { %3006 = vmatprep.subr.mxu1 %v3651_v18 }
 0x4de   :  { %v2438_v50 = vpop.f32.mrb[12].mxu1 }
 0x4df   :  { %v2439_v51 = vadd.f32 %v2919_v49, %v2438_v50  ;;  %v2992_v52 = vpop.f32.mrb[13].mxu1 }
 0x4e0   :  { %v2441_v53 = vpop.f32.mrb[14].mxu1 }
 0x4e1   :  { %v2444_v54 = vmax.f32 %v2439_v51, 0.0  ;;  %v2993_v55 = vpop.f32.mrb[15].mxu1 }
 0x4e3   :  { %v2445_v56 = vpack.c.bf16 %v2444_v54, %v2444_v54 }
 0x4e5   :  { %3003 = vmatmul.mubr.msk.bf16.vlgmr.msra.gmra.mrb[16].mxu1 %vm2485_vm2, %v2445_v56 }
 0x4e6   :  { %3008 = vmatprep.mubr.msk.f32.mxu1 %vm3652_vm1, %v3651_v18 }
 0x5b8   :  { %v2523_v59 = vpop.f32.mrb[16].mxu1 }
 0x5b9   :  { %v2524_v60 = vadd.f32 %v2928_v58, %v2523_v59  ;;  %v3004_v61 = vpop.f32.mrb[17].mxu1 }
 0x5ba   :  { %v2526_v62 = vpop.f32.mrb[18].mxu1 }
 0x5bb   :  { %v2529_v63 = vmax.f32 %v2524_v60, 0.0  ;;  %v3005_v0 = vpop.f32.mrb[19].mxu1 }
 0x5bd   :  { %v2530_v2 = vpack.c.bf16 %v2529_v63, %v2529_v63 }
 0x5bf   :  { %v2532_v3 = vunpack.c.l.bf16 %v2530_v2 }
 0x5c1   :  { %3007 = vmatpush3.xpose.msk.msra.mxu1 %vm2543_vm3, %v2532_v3 }
 0x5c4   :  { %3009 = vmatmul.mubr.msk.f32.vlgmr.msra.gmra.mrb[20].mxu1 %vm2543_vm3, %v2531_v4 }
 0x697   :  { %v2616_v7 = vpop.f32.mrb[20].mxu1 }
 0x698   :  { %v2617_v8 = vadd.f32 %v2616_v7, %v2542_v6  ;;  %v3010_v9 = vpop.f32.mrb[21].mxu1 }
 0x69a   :  { %2621 = vst.msk [vmem:[#allocation14] sm:$0x1] %vm2620_vm4, %v2617_v8 }
 0x69b   :  { %3619 = shalt.err (!%p3616_p10)
}
 0x69c   :  { %s3620_s1 = scalar_lea.hbm %s3972_s13, 16 }
 0x69d   :  { %p3621_p11 = scmp.ne.s32.totalorder %s3972_s13, %s3620_s1  ;;  %p3624_p12 = scmp.lt.u32.totalorder %s3620_s1, %s3972_s13 }
 0x69f   :  { %p3626_p13 = pnand %p3624_p12, %p3621_p11 }
 0x6a1   :  { %3629 = shalt.err (!%p3626_p13)
}
 0x6a2   :  { %2631 = dma.vmem_to_hbm [thread:$0]  %s2629_s10, 16, %s3972_s13, [#allocation5]  }
 0x6a3   :  { %3638 = dma.done.wait [#allocation5], 16  }
 0x6a4   :  { %3639 = vsyncadd [#allocation5], 4294967280 }
 0x6a5   :  { %2635 = vsyncpa [#allocation4], 1 }
 0x6a6   :  { %2636 = vsyncpa [#allocation7], 1 }
 0x6a7   :  { %2637 = vsyncpa [#allocation10], 1 }
 0x6a8   :  { %2638 = vsyncpa [#allocation13], 1 }
 0x6a9   :  { %2639 = vsyncpa [#allocation5], 1 }

</bundles_post_ra>
